<compile_context>
chip_gen: v7x
topology: tpu7x:2x2x1
jax: 0.10.0
libtpu: 0.0.40
codegen_flags: <defaults>
</compile_context>

<pallas_src>
import functools

import jax
import jax.numpy as jnp
import numpy as np
from jax.experimental import pallas as pl
from jax.experimental.pallas import tpu as pltpu


# ----------------------------------------------------------------------------
# Fused encoder kernel: one grid step == one transformer Block
# ----------------------------------------------------------------------------
def _encoder_kernel(B, S, num_heads, head_dim,
                    x_ref,
                    wqkv_ref, bqkv_ref, wp_ref, bp_ref,
                    w1_ref, b1_ref, w2_ref, b2_ref,
                    o_ref, attn_scr):
    """Applies Block #d (d = program_id(0)) to the resident residual stream.

    x_ref    : (B*S, C) f32  initial tokens (read only at d == 0; HBM-aliased to o)
    wqkv     : (C, 3C) bf16 (scale folded into Q cols)   bqkv : (1, 3C) f32
    wp       : (C, C)  bf16                              bp   : (1, C)  f32
    w1       : (C, Hid) bf16                             b1   : (1, Hid) f32
    w2       : (Hid, C) bf16                             b2   : (1, C)  f32
    o_ref    : (B*S, C) f32  residual stream, resident across the depth grid
    attn_scr : (B*S, C) f32  VMEM scratch for merged attention head outputs
    """
    d = pl.program_id(0)
    C = num_heads * head_dim

    @pl.when(d == 0)
    def _():
        o_ref[...] = x_ref[...]

    x = o_ref[...]                                         # (B*S, C) f32 residual

    # ---- MHSA: one full-width QKV matmul (bf16 operands, f32 accumulation) ----
    # Attention scale is already folded into the Q third of wqkv / bqkv.
    qkv = jnp.dot(x.astype(jnp.bfloat16), wqkv_ref[...],
                  preferred_element_type=jnp.float32) + bqkv_ref[...]   # (B*S, 3C)

    # Per-batch, per-head attention on (S, S) tiles: no cross-batch scores, no
    # additive mask. Head outputs go into VMEM scratch at static lane offsets.
    for b in range(B):                                     # static loop, B=2
        r0 = b * S
        for h in range(num_heads):                         # static loop, H=4
            c0 = h * head_dim
            q = qkv[r0:r0 + S, c0:c0 + head_dim].astype(jnp.bfloat16)
            k = qkv[r0:r0 + S, C + c0:C + c0 + head_dim].astype(jnp.bfloat16)
            v = qkv[r0:r0 + S, 2 * C + c0:2 * C + c0 + head_dim].astype(jnp.bfloat16)
            # q @ k^T without an explicit transpose: contract last dims of both.
            s = jax.lax.dot_general(q, k, (((1,), (1,)), ((), ())),
                                    preferred_element_type=jnp.float32)  # (S, S)
            s = s - jnp.max(s, axis=-1, keepdims=True)
            e = jnp.exp(s)
            p = e * pl.reciprocal(jnp.sum(e, axis=-1, keepdims=True), approx=True)
            av = jnp.dot(p.astype(jnp.bfloat16), v,
                         preferred_element_type=jnp.float32)             # (S, hd)
            attn_scr[pl.ds(r0, S), pl.ds(c0, head_dim)] = av

    attn = attn_scr[...]                                   # (B*S, C), PyTorch head order
    x = x + jnp.dot(attn.astype(jnp.bfloat16), wp_ref[...],
                    preferred_element_type=jnp.float32) + bp_ref[...]

    # ---- MLP ----
    h1 = jnp.dot(x.astype(jnp.bfloat16), w1_ref[...],
                 preferred_element_type=jnp.float32) + b1_ref[...]
    h1 = jnp.maximum(h1, 0.0)                              # ReLU
    x = x + jnp.dot(h1.astype(jnp.bfloat16), w2_ref[...],
                    preferred_element_type=jnp.float32) + b2_ref[...]

    o_ref[...] = x.astype(o_ref.dtype)


# ----------------------------------------------------------------------------
# pallas_call plumbing
# ----------------------------------------------------------------------------
def _stacked_spec(arr):
    """Depth-stacked weight: squeeze the leading depth dim, kernel gets 2-D ref."""
    nd = arr.ndim
    return pl.BlockSpec((pl.Squeezed(),) + tuple(arr.shape[1:]),
                        lambda d, _n=nd: (d,) + (0,) * (_n - 1))


def _full_spec(arr):
    """Full-array block with constant index across the depth grid."""
    shape = tuple(arr.shape)
    return pl.BlockSpec(shape, lambda d, _n=len(shape): (0,) * _n)


def run_encoder(x_tokens, stacked, cfg):
    BS, C = x_tokens.shape
    S = cfg["num_patches"] + 1
    B = BS // S
    depth = cfg["depth"]
    kern = functools.partial(_encoder_kernel, B, S, cfg["num_heads"], cfg["head_dim"])
    return pl.pallas_call(
        kern,
        out_shape=jax.ShapeDtypeStruct((BS, C), x_tokens.dtype),
        grid=(depth,),
        in_specs=[
            _full_spec(x_tokens),
            _stacked_spec(stacked["wqkv"]), _stacked_spec(stacked["bqkv"]),
            _stacked_spec(stacked["wp"]), _stacked_spec(stacked["bp"]),
            _stacked_spec(stacked["w1"]), _stacked_spec(stacked["b1"]),
            _stacked_spec(stacked["w2"]), _stacked_spec(stacked["b2"]),
        ],
        out_specs=pl.BlockSpec((BS, C), lambda d: (0, 0)),
        scratch_shapes=[pltpu.VMEM((BS, C), jnp.float32)],
        input_output_aliases={0: 0},                       # token slab == output slab
        compiler_params=pltpu.CompilerParams(
            dimension_semantics=("arbitrary",),            # depth-carried residual
            vmem_limit_bytes=32 * 1024 * 1024),
    )(x_tokens, stacked["wqkv"], stacked["bqkv"], stacked["wp"], stacked["bp"],
      stacked["w1"], stacked["b1"], stacked["w2"], stacked["b2"])


def transformer_forward(x_img, params, cfg):
    """forward_features of the PyTorch `transfomer` module (eval mode)."""
    B, Cin, H, W = x_img.shape
    C = cfg["embed_dim"]
    S = cfg["num_patches"] + 1
    # 1x1-conv patch embed == per-pixel linear; flatten(2).transpose(1,2) ordering.
    # Tiny matmul -> left to XLA in the wrapper (a standalone pallas_call would be
    # pure launch/DMA overhead).
    tok_in = jnp.transpose(x_img, (0, 2, 3, 1)).reshape(B, H * W, Cin)
    tokens = tok_in @ params["pe_w"] + params["pe_b"]
    cls = jnp.broadcast_to(params["cls_token"], (B, 1, C))
    x = jnp.concatenate([cls, tokens], axis=1) + params["pos_embed"]   # (B, S, C)
    # TODO(synk): Dropout / DropPath / pos_drop are stochastic training-time ops;
    # eval-mode forward => identity.
    x = x.reshape(B * S, C)                                # fold batch into sublanes
    out = run_encoder(x, params["stacked"], cfg)
    return out.reshape(B, S, C)[:, 0]                      # pre_logits = Identity


# ----------------------------------------------------------------------------
# Deterministic parameter construction + pure-JAX reference
# ----------------------------------------------------------------------------
def make_params(key, cfg):
    Cin, C = cfg["in_c"], cfg["embed_dim"]
    Hid = cfg["mlp_hidden"]
    depth = cfg["depth"]
    scale = cfg["scale"]
    n_tokens = cfg["num_patches"] + 1
    ks = jax.random.split(key, 2 + 6 * depth)
    s = 0.05

    params = {
        "pe_w": jax.random.normal(ks[0], (Cin, C), jnp.float32) * s,
        "pe_b": jax.random.normal(ks[1], (1, C), jnp.float32) * s,
        "cls_token": jnp.zeros((1, 1, C), jnp.float32),
        "pos_embed": jnp.zeros((1, n_tokens, C), jnp.float32),
        "full_blocks": [],   # un-split, un-scaled f32 versions for the reference
    }
    wqkv, bqkv, wp, bp, w1, b1, w2, b2 = ([] for _ in range(8))
    for d in range(depth):
        k0, k1, k2, k3, k4, k5 = ks[2 + 6 * d: 2 + 6 * (d + 1)]
        qkv_w = jax.random.normal(k0, (C, 3 * C), jnp.float32) * s    # (in, out)
        qkv_b = jax.random.normal(k1, (3 * C,), jnp.float32) * s
        proj_w = jax.random.normal(k2, (C, C), jnp.float32) * s
        proj_b = jax.random.normal(k3, (C,), jnp.float32) * s
        fc1_w = jax.random.normal(k4, (C, Hid), jnp.float32) * s
        fc1_b = jnp.zeros((Hid,), jnp.float32)
        fc2_w = jax.random.normal(k5, (Hid, C), jnp.float32) * s
        fc2_b = jnp.zeros((C,), jnp.float32)

        # Fold the attention scale into the Q third of the QKV weight and bias
        # (kernel copies only); the reference keeps raw weights + explicit scale.
        qkv_w_k = qkv_w.at[:, :C].multiply(scale)
        qkv_b_k = qkv_b.at[:C].multiply(scale)

        wqkv.append(qkv_w_k); bqkv.append(qkv_b_k.reshape(1, 3 * C))
        wp.append(proj_w);    bp.append(proj_b.reshape(1, C))
        w1.append(fc1_w);     b1.append(fc1_b.reshape(1, Hid))
        w2.append(fc2_w);     b2.append(fc2_b.reshape(1, C))
        params["full_blocks"].append({
            "qkv_w": qkv_w, "qkv_b": qkv_b, "proj_w": proj_w, "proj_b": proj_b,
            "fc1_w": fc1_w, "fc1_b": fc1_b, "fc2_w": fc2_w, "fc2_b": fc2_b,
        })

    # Depth-stacked weights for the fused kernel; matmul operands in bf16,
    # biases stay f32 (added after the f32 MXU accumulation).
    params["stacked"] = {
        "wqkv": jnp.stack(wqkv).astype(jnp.bfloat16),
        "bqkv": jnp.stack(bqkv),
        "wp": jnp.stack(wp).astype(jnp.bfloat16),
        "bp": jnp.stack(bp),
        "w1": jnp.stack(w1).astype(jnp.bfloat16),
        "b1": jnp.stack(b1),
        "w2": jnp.stack(w2).astype(jnp.bfloat16),
        "b2": jnp.stack(b2),
    }
    return params


def reference_forward(x_img, params, cfg):
    B, Cin, Himg, Wimg = x_img.shape
    C, H, hd = cfg["embed_dim"], cfg["num_heads"], cfg["head_dim"]
    tok_in = jnp.transpose(x_img, (0, 2, 3, 1)).reshape(B, Himg * Wimg, Cin)
    x = tok_in @ params["pe_w"] + params["pe_b"]
    cls = jnp.broadcast_to(params["cls_token"], (B, 1, C))
    x = jnp.concatenate([cls, x], axis=1) + params["pos_embed"]
    S = x.shape[1]
    for p in params["full_blocks"]:
        qkv = x @ p["qkv_w"] + p["qkv_b"]
        qkv = qkv.reshape(B, S, 3, H, hd).transpose(2, 0, 3, 1, 4)
        q, k, v = qkv[0], qkv[1], qkv[2]                      # (B,H,S,hd)
        attn = jnp.einsum("bhqd,bhkd->bhqk", q, k) * cfg["scale"]
        attn = jax.nn.softmax(attn, axis=-1)
        ao = jnp.einsum("bhqk,bhkd->bhqd", attn, v).transpose(0, 2, 1, 3).reshape(B, S, C)
        x = x + ao @ p["proj_w"] + p["proj_b"]
        h1 = jax.nn.relu(x @ p["fc1_w"] + p["fc1_b"])
        x = x + h1 @ p["fc2_w"] + p["fc2_b"]
    return x[:, 0]


# ----------------------------------------------------------------------------
if __name__ == "__main__":
    # Small shapes consistent with the module (img 4x4, 1x1 patches, dim=32).
    cfg = dict(img_size=4, in_c=32, embed_dim=32, num_heads=4, depth=2, mlp_ratio=4)
    cfg["head_dim"] = cfg["embed_dim"] // cfg["num_heads"]
    cfg["scale"] = cfg["head_dim"] ** (-0.5)
    cfg["mlp_hidden"] = int(cfg["embed_dim"] * cfg["mlp_ratio"])
    cfg["num_patches"] = cfg["img_size"] * cfg["img_size"]

    key = jax.random.PRNGKey(0)
    k_in, k_par = jax.random.split(key)
    B = 2
    x_img = jax.random.normal(k_in, (B, cfg["in_c"], cfg["img_size"], cfg["img_size"]),
                              jnp.float32)
    params = make_params(k_par, cfg)

    fwd = jax.jit(functools.partial(transformer_forward, cfg=cfg))
    out = jax.block_until_ready(fwd(x_img, params))

    ref = jax.block_until_ready(reference_forward(x_img, params, cfg))
    assert out.shape == (B, cfg["embed_dim"]), out.shape
    assert np.allclose(np.asarray(out), np.asarray(ref), atol=2e-2, rtol=2e-2), (
        np.max(np.abs(np.asarray(out) - np.asarray(ref))))
    print("KERNEL_OK")
</pallas_src>

<mosaic_0001>
module attributes {stable_mosaic.version = 11 : i64} {
  func.func @_encoder_kernel(%arg0: i32, %arg1: memref<34x32xf32, #tpu.memory_space<vmem>>, %arg2: memref<1x32x96xbf16, #tpu.memory_space<vmem>>, %arg3: memref<1x1x96xf32, #tpu.memory_space<vmem>>, %arg4: memref<1x32x32xbf16, #tpu.memory_space<vmem>>, %arg5: memref<1x1x32xf32, #tpu.memory_space<vmem>>, %arg6: memref<1x32x128xbf16, #tpu.memory_space<vmem>>, %arg7: memref<1x1x128xf32, #tpu.memory_space<vmem>>, %arg8: memref<1x128x32xbf16, #tpu.memory_space<vmem>>, %arg9: memref<1x1x32xf32, #tpu.memory_space<vmem>>, %arg10: memref<34x32xf32, #tpu.memory_space<vmem>>, %arg11: memref<34x32xf32, #tpu.memory_space<vmem>>) attributes {dimension_semantics = [#tpu.dimension_semantics<arbitrary>], iteration_bounds = array<i64: 2>, scalar_prefetch = 0 : i64, scratch_operands = 1 : i64, tpu.core_type = #tpu.core_type<tc>, window_params = [{pipeline_mode = #tpu.pipeline_mode<synchronous>, transform_indices = @transform_0, window_bounds = array<i64: 34, 32>}, {transform_indices = @transform_1, window_bounds = array<i64: 1, 32, 96>}, {transform_indices = @transform_2, window_bounds = array<i64: 1, 1, 96>}, {transform_indices = @transform_3, window_bounds = array<i64: 1, 32, 32>}, {transform_indices = @transform_4, window_bounds = array<i64: 1, 1, 32>}, {transform_indices = @transform_5, window_bounds = array<i64: 1, 32, 128>}, {transform_indices = @transform_6, window_bounds = array<i64: 1, 1, 128>}, {transform_indices = @transform_7, window_bounds = array<i64: 1, 128, 32>}, {transform_indices = @transform_8, window_bounds = array<i64: 1, 1, 32>}, {pipeline_mode = #tpu.pipeline_mode<synchronous>, transform_indices = @transform_9, window_bounds = array<i64: 34, 32>}]} {
    %c0_i32 = arith.constant 0 : i32
    %0 = arith.cmpi eq, %arg0, %c0_i32 : i32
    %1 = arith.extui %0 : i1 to i32
    %c0_i32_0 = arith.constant 0 : i32
    %2 = arith.cmpi ne, %1, %c0_i32_0 : i32
    scf.if %2 {
      %c0_78 = arith.constant 0 : index
      %c0_79 = arith.constant 0 : index
      %202 = vector.load %arg1[%c0_78, %c0_79] : memref<34x32xf32, #tpu.memory_space<vmem>>, vector<34x32xf32>
      %c0_80 = arith.constant 0 : index
      %c0_81 = arith.constant 0 : index
      %203 = vector.load %arg10[%c0_80, %c0_81] : memref<34x32xf32, #tpu.memory_space<vmem>>, vector<34x32xf32>
      tpu.vector_store %arg10[%c0_80, %c0_81], %202 {strides = array<i32>} : memref<34x32xf32, #tpu.memory_space<vmem>>, vector<34x32xf32>,
    } else {
    }
    %c0 = arith.constant 0 : index
    %c0_1 = arith.constant 0 : index
    %3 = vector.load %arg10[%c0, %c0_1] : memref<34x32xf32, #tpu.memory_space<vmem>>, vector<34x32xf32>
    %4 = arith.truncf %3 : vector<34x32xf32> to vector<34x32xbf16>
    %c0_2 = arith.constant 0 : index
    %c0_3 = arith.constant 0 : index
    %c0_4 = arith.constant 0 : index
    %5 = vector.load %arg2[%c0_2, %c0_3, %c0_4] : memref<1x32x96xbf16, #tpu.memory_space<vmem>>, vector<1x32x96xbf16>
    %6 = vector.shape_cast %5 : vector<1x32x96xbf16> to vector<32x96xbf16>
    %cst = arith.constant dense<0.000000e+00> : vector<34x96xf32>
    %7 = tpu.matmul %4, %6, %cst {dimension_numbers = #tpu.dot_dimension_numbers<[1], [0], [0], [1], [0, 0, 1, 1], [], []>} : vector<34x32xbf16>, vector<32x96xbf16>, vector<34x96xf32> -> vector<34x96xf32>
    %c0_5 = arith.constant 0 : index
    %c0_6 = arith.constant 0 : index
    %c0_7 = arith.constant 0 : index
    %8 = vector.load %arg3[%c0_5, %c0_6, %c0_7] : memref<1x1x96xf32, #tpu.memory_space<vmem>>, vector<1x1x96xf32>
    %9 = vector.shape_cast %8 : vector<1x1x96xf32> to vector<1x96xf32>
    %10 = vector.broadcast %9 : vector<1x96xf32> to vector<34x96xf32>
    %11 = arith.addf %7, %10 : vector<34x96xf32>
    %12 = vector.extract_strided_slice %11 {offsets = [0, 0], sizes = [17, 8], strides = [1, 1]} : vector<34x96xf32> to vector<17x8xf32>
    %13 = arith.truncf %12 : vector<17x8xf32> to vector<17x8xbf16>
    %14 = vector.extract_strided_slice %11 {offsets = [0, 32], sizes = [17, 8], strides = [1, 1]} : vector<34x96xf32> to vector<17x8xf32>
    %15 = arith.truncf %14 : vector<17x8xf32> to vector<17x8xbf16>
    %16 = vector.extract_strided_slice %11 {offsets = [0, 64], sizes = [17, 8], strides = [1, 1]} : vector<34x96xf32> to vector<17x8xf32>
    %17 = arith.truncf %16 : vector<17x8xf32> to vector<17x8xbf16>
    %cst_8 = arith.constant dense<0.000000e+00> : vector<17x17xf32>
    %18 = tpu.matmul %13, %15, %cst_8 {dimension_numbers = #tpu.dot_dimension_numbers<[1], [1], [0], [0], [0, 0, 1, 0], [], []>} : vector<17x8xbf16>, vector<17x8xbf16>, vector<17x17xf32> -> vector<17x17xf32>
    %cst_9 = arith.constant dense<0xFF800000> : vector<17xf32>
    %19 = vector.multi_reduction <maximumf>, %18, %cst_9 [1] : vector<17x17xf32> to vector<17xf32>
    %20 = vector.shape_cast %19 : vector<17xf32> to vector<17x1xf32>
    %21 = vector.broadcast %20 : vector<17x1xf32> to vector<17x17xf32>
    %22 = arith.subf %18, %21 : vector<17x17xf32>
    %23 = math.exp %22 : vector<17x17xf32>
    %cst_10 = arith.constant dense<0.000000e+00> : vector<17xf32>
    %24 = vector.multi_reduction <add>, %23, %cst_10 [1] : vector<17x17xf32> to vector<17xf32>
    %25 = vector.shape_cast %24 : vector<17xf32> to vector<17x1xf32>
    %26 = tpu.reciprocal %25 {approx = true} : vector<17x1xf32> -> vector<17x1xf32>
    %27 = vector.broadcast %26 : vector<17x1xf32> to vector<17x17xf32>
    %28 = arith.mulf %23, %27 : vector<17x17xf32>
    %29 = arith.truncf %28 : vector<17x17xf32> to vector<17x17xbf16>
    %cst_11 = arith.constant dense<0.000000e+00> : vector<17x8xf32>
    %30 = tpu.matmul %29, %17, %cst_11 {dimension_numbers = #tpu.dot_dimension_numbers<[1], [0], [0], [1], [0, 0, 1, 1], [], []>} : vector<17x17xbf16>, vector<17x8xbf16>, vector<17x8xf32> -> vector<17x8xf32>
    %c0_12 = arith.constant 0 : index
    %c0_13 = arith.constant 0 : index
    %31 = vector.load %arg11[%c0_12, %c0_13] : memref<34x32xf32, #tpu.memory_space<vmem>>, vector<17x8xf32>
    tpu.vector_store %arg11[%c0_12, %c0_13], %30 {strides = array<i32>} : memref<34x32xf32, #tpu.memory_space<vmem>>, vector<17x8xf32>,
    %32 = vector.extract_strided_slice %11 {offsets = [0, 8], sizes = [17, 8], strides = [1, 1]} : vector<34x96xf32> to vector<17x8xf32>
    %33 = arith.truncf %32 : vector<17x8xf32> to vector<17x8xbf16>
    %34 = vector.extract_strided_slice %11 {offsets = [0, 40], sizes = [17, 8], strides = [1, 1]} : vector<34x96xf32> to vector<17x8xf32>
    %35 = arith.truncf %34 : vector<17x8xf32> to vector<17x8xbf16>
    %36 = vector.extract_strided_slice %11 {offsets = [0, 72], sizes = [17, 8], strides = [1, 1]} : vector<34x96xf32> to vector<17x8xf32>
    %37 = arith.truncf %36 : vector<17x8xf32> to vector<17x8xbf16>
    %cst_14 = arith.constant dense<0.000000e+00> : vector<17x17xf32>
    %38 = tpu.matmul %33, %35, %cst_14 {dimension_numbers = #tpu.dot_dimension_numbers<[1], [1], [0], [0], [0, 0, 1, 0], [], []>} : vector<17x8xbf16>, vector<17x8xbf16>, vector<17x17xf32> -> vector<17x17xf32>
    %cst_15 = arith.constant dense<0xFF800000> : vector<17xf32>
    %39 = vector.multi_reduction <maximumf>, %38, %cst_15 [1] : vector<17x17xf32> to vector<17xf32>
    %40 = vector.shape_cast %39 : vector<17xf32> to vector<17x1xf32>
    %41 = vector.broadcast %40 : vector<17x1xf32> to vector<17x17xf32>
    %42 = arith.subf %38, %41 : vector<17x17xf32>
    %43 = math.exp %42 : vector<17x17xf32>
    %cst_16 = arith.constant dense<0.000000e+00> : vector<17xf32>
    %44 = vector.multi_reduction <add>, %43, %cst_16 [1] : vector<17x17xf32> to vector<17xf32>
    %45 = vector.shape_cast %44 : vector<17xf32> to vector<17x1xf32>
    %46 = tpu.reciprocal %45 {approx = true} : vector<17x1xf32> -> vector<17x1xf32>
    %47 = vector.broadcast %46 : vector<17x1xf32> to vector<17x17xf32>
    %48 = arith.mulf %43, %47 : vector<17x17xf32>
    %49 = arith.truncf %48 : vector<17x17xf32> to vector<17x17xbf16>
    %cst_17 = arith.constant dense<0.000000e+00> : vector<17x8xf32>
    %50 = tpu.matmul %49, %37, %cst_17 {dimension_numbers = #tpu.dot_dimension_numbers<[1], [0], [0], [1], [0, 0, 1, 1], [], []>} : vector<17x17xbf16>, vector<17x8xbf16>, vector<17x8xf32> -> vector<17x8xf32>
    %c0_18 = arith.constant 0 : index
    %c8 = arith.constant 8 : index
    %51 = vector.load %arg11[%c0_18, %c8] : memref<34x32xf32, #tpu.memory_space<vmem>>, vector<17x8xf32>
    tpu.vector_store %arg11[%c0_18, %c8], %50 {strides = array<i32>} : memref<34x32xf32, #tpu.memory_space<vmem>>, vector<17x8xf32>,
    %52 = vector.extract_strided_slice %11 {offsets = [0, 16], sizes = [17, 8], strides = [1, 1]} : vector<34x96xf32> to vector<17x8xf32>
    %53 = arith.truncf %52 : vector<17x8xf32> to vector<17x8xbf16>
    %54 = vector.extract_strided_slice %11 {offsets = [0, 48], sizes = [17, 8], strides = [1, 1]} : vector<34x96xf32> to vector<17x8xf32>
    %55 = arith.truncf %54 : vector<17x8xf32> to vector<17x8xbf16>
    %56 = vector.extract_strided_slice %11 {offsets = [0, 80], sizes = [17, 8], strides = [1, 1]} : vector<34x96xf32> to vector<17x8xf32>
    %57 = arith.truncf %56 : vector<17x8xf32> to vector<17x8xbf16>
    %cst_19 = arith.constant dense<0.000000e+00> : vector<17x17xf32>
    %58 = tpu.matmul %53, %55, %cst_19 {dimension_numbers = #tpu.dot_dimension_numbers<[1], [1], [0], [0], [0, 0, 1, 0], [], []>} : vector<17x8xbf16>, vector<17x8xbf16>, vector<17x17xf32> -> vector<17x17xf32>
    %cst_20 = arith.constant dense<0xFF800000> : vector<17xf32>
    %59 = vector.multi_reduction <maximumf>, %58, %cst_20 [1] : vector<17x17xf32> to vector<17xf32>
    %60 = vector.shape_cast %59 : vector<17xf32> to vector<17x1xf32>
    %61 = vector.broadcast %60 : vector<17x1xf32> to vector<17x17xf32>
    %62 = arith.subf %58, %61 : vector<17x17xf32>
    %63 = math.exp %62 : vector<17x17xf32>
    %cst_21 = arith.constant dense<0.000000e+00> : vector<17xf32>
    %64 = vector.multi_reduction <add>, %63, %cst_21 [1] : vector<17x17xf32> to vector<17xf32>
    %65 = vector.shape_cast %64 : vector<17xf32> to vector<17x1xf32>
    %66 = tpu.reciprocal %65 {approx = true} : vector<17x1xf32> -> vector<17x1xf32>
    %67 = vector.broadcast %66 : vector<17x1xf32> to vector<17x17xf32>
    %68 = arith.mulf %63, %67 : vector<17x17xf32>
    %69 = arith.truncf %68 : vector<17x17xf32> to vector<17x17xbf16>
    %cst_22 = arith.constant dense<0.000000e+00> : vector<17x8xf32>
    %70 = tpu.matmul %69, %57, %cst_22 {dimension_numbers = #tpu.dot_dimension_numbers<[1], [0], [0], [1], [0, 0, 1, 1], [], []>} : vector<17x17xbf16>, vector<17x8xbf16>, vector<17x8xf32> -> vector<17x8xf32>
    %c0_23 = arith.constant 0 : index
    %c16 = arith.constant 16 : index
    %71 = vector.load %arg11[%c0_23, %c16] : memref<34x32xf32, #tpu.memory_space<vmem>>, vector<17x8xf32>
    tpu.vector_store %arg11[%c0_23, %c16], %70 {strides = array<i32>} : memref<34x32xf32, #tpu.memory_space<vmem>>, vector<17x8xf32>,
    %72 = vector.extract_strided_slice %11 {offsets = [0, 24], sizes = [17, 8], strides = [1, 1]} : vector<34x96xf32> to vector<17x8xf32>
    %73 = arith.truncf %72 : vector<17x8xf32> to vector<17x8xbf16>
    %74 = vector.extract_strided_slice %11 {offsets = [0, 56], sizes = [17, 8], strides = [1, 1]} : vector<34x96xf32> to vector<17x8xf32>
    %75 = arith.truncf %74 : vector<17x8xf32> to vector<17x8xbf16>
    %76 = vector.extract_strided_slice %11 {offsets = [0, 88], sizes = [17, 8], strides = [1, 1]} : vector<34x96xf32> to vector<17x8xf32>
    %77 = arith.truncf %76 : vector<17x8xf32> to vector<17x8xbf16>
    %cst_24 = arith.constant dense<0.000000e+00> : vector<17x17xf32>
    %78 = tpu.matmul %73, %75, %cst_24 {dimension_numbers = #tpu.dot_dimension_numbers<[1], [1], [0], [0], [0, 0, 1, 0], [], []>} : vector<17x8xbf16>, vector<17x8xbf16>, vector<17x17xf32> -> vector<17x17xf32>
    %cst_25 = arith.constant dense<0xFF800000> : vector<17xf32>
    %79 = vector.multi_reduction <maximumf>, %78, %cst_25 [1] : vector<17x17xf32> to vector<17xf32>
    %80 = vector.shape_cast %79 : vector<17xf32> to vector<17x1xf32>
    %81 = vector.broadcast %80 : vector<17x1xf32> to vector<17x17xf32>
    %82 = arith.subf %78, %81 : vector<17x17xf32>
    %83 = math.exp %82 : vector<17x17xf32>
    %cst_26 = arith.constant dense<0.000000e+00> : vector<17xf32>
    %84 = vector.multi_reduction <add>, %83, %cst_26 [1] : vector<17x17xf32> to vector<17xf32>
    %85 = vector.shape_cast %84 : vector<17xf32> to vector<17x1xf32>
    %86 = tpu.reciprocal %85 {approx = true} : vector<17x1xf32> -> vector<17x1xf32>
    %87 = vector.broadcast %86 : vector<17x1xf32> to vector<17x17xf32>
    %88 = arith.mulf %83, %87 : vector<17x17xf32>
    %89 = arith.truncf %88 : vector<17x17xf32> to vector<17x17xbf16>
    %cst_27 = arith.constant dense<0.000000e+00> : vector<17x8xf32>
    %90 = tpu.matmul %89, %77, %cst_27 {dimension_numbers = #tpu.dot_dimension_numbers<[1], [0], [0], [1], [0, 0, 1, 1], [], []>} : vector<17x17xbf16>, vector<17x8xbf16>, vector<17x8xf32> -> vector<17x8xf32>
    %c0_28 = arith.constant 0 : index
    %c24 = arith.constant 24 : index
    %91 = vector.load %arg11[%c0_28, %c24] : memref<34x32xf32, #tpu.memory_space<vmem>>, vector<17x8xf32>
    tpu.vector_store %arg11[%c0_28, %c24], %90 {strides = array<i32>} : memref<34x32xf32, #tpu.memory_space<vmem>>, vector<17x8xf32>,
    %92 = vector.extract_strided_slice %11 {offsets = [17, 0], sizes = [17, 8], strides = [1, 1]} : vector<34x96xf32> to vector<17x8xf32>
    %93 = arith.truncf %92 : vector<17x8xf32> to vector<17x8xbf16>
    %94 = vector.extract_strided_slice %11 {offsets = [17, 32], sizes = [17, 8], strides = [1, 1]} : vector<34x96xf32> to vector<17x8xf32>
    %95 = arith.truncf %94 : vector<17x8xf32> to vector<17x8xbf16>
    %96 = vector.extract_strided_slice %11 {offsets = [17, 64], sizes = [17, 8], strides = [1, 1]} : vector<34x96xf32> to vector<17x8xf32>
    %97 = arith.truncf %96 : vector<17x8xf32> to vector<17x8xbf16>
    %cst_29 = arith.constant dense<0.000000e+00> : vector<17x17xf32>
    %98 = tpu.matmul %93, %95, %cst_29 {dimension_numbers = #tpu.dot_dimension_numbers<[1], [1], [0], [0], [0, 0, 1, 0], [], []>} : vector<17x8xbf16>, vector<17x8xbf16>, vector<17x17xf32> -> vector<17x17xf32>
    %cst_30 = arith.constant dense<0xFF800000> : vector<17xf32>
    %99 = vector.multi_reduction <maximumf>, %98, %cst_30 [1] : vector<17x17xf32> to vector<17xf32>
    %100 = vector.shape_cast %99 : vector<17xf32> to vector<17x1xf32>
    %101 = vector.broadcast %100 : vector<17x1xf32> to vector<17x17xf32>
    %102 = arith.subf %98, %101 : vector<17x17xf32>
    %103 = math.exp %102 : vector<17x17xf32>
    %cst_31 = arith.constant dense<0.000000e+00> : vector<17xf32>
    %104 = vector.multi_reduction <add>, %103, %cst_31 [1] : vector<17x17xf32> to vector<17xf32>
    %105 = vector.shape_cast %104 : vector<17xf32> to vector<17x1xf32>
    %106 = tpu.reciprocal %105 {approx = true} : vector<17x1xf32> -> vector<17x1xf32>
    %107 = vector.broadcast %106 : vector<17x1xf32> to vector<17x17xf32>
    %108 = arith.mulf %103, %107 : vector<17x17xf32>
    %109 = arith.truncf %108 : vector<17x17xf32> to vector<17x17xbf16>
    %cst_32 = arith.constant dense<0.000000e+00> : vector<17x8xf32>
    %110 = tpu.matmul %109, %97, %cst_32 {dimension_numbers = #tpu.dot_dimension_numbers<[1], [0], [0], [1], [0, 0, 1, 1], [], []>} : vector<17x17xbf16>, vector<17x8xbf16>, vector<17x8xf32> -> vector<17x8xf32>
    %c17 = arith.constant 17 : index
    %c0_33 = arith.constant 0 : index
    %111 = vector.load %arg11[%c17, %c0_33] : memref<34x32xf32, #tpu.memory_space<vmem>>, vector<17x8xf32>
    tpu.vector_store %arg11[%c17, %c0_33], %110 {strides = array<i32>} : memref<34x32xf32, #tpu.memory_space<vmem>>, vector<17x8xf32>,
    %112 = vector.extract_strided_slice %11 {offsets = [17, 8], sizes = [17, 8], strides = [1, 1]} : vector<34x96xf32> to vector<17x8xf32>
    %113 = arith.truncf %112 : vector<17x8xf32> to vector<17x8xbf16>
    %114 = vector.extract_strided_slice %11 {offsets = [17, 40], sizes = [17, 8], strides = [1, 1]} : vector<34x96xf32> to vector<17x8xf32>
    %115 = arith.truncf %114 : vector<17x8xf32> to vector<17x8xbf16>
    %116 = vector.extract_strided_slice %11 {offsets = [17, 72], sizes = [17, 8], strides = [1, 1]} : vector<34x96xf32> to vector<17x8xf32>
    %117 = arith.truncf %116 : vector<17x8xf32> to vector<17x8xbf16>
    %cst_34 = arith.constant dense<0.000000e+00> : vector<17x17xf32>
    %118 = tpu.matmul %113, %115, %cst_34 {dimension_numbers = #tpu.dot_dimension_numbers<[1], [1], [0], [0], [0, 0, 1, 0], [], []>} : vector<17x8xbf16>, vector<17x8xbf16>, vector<17x17xf32> -> vector<17x17xf32>
    %cst_35 = arith.constant dense<0xFF800000> : vector<17xf32>
    %119 = vector.multi_reduction <maximumf>, %118, %cst_35 [1] : vector<17x17xf32> to vector<17xf32>
    %120 = vector.shape_cast %119 : vector<17xf32> to vector<17x1xf32>
    %121 = vector.broadcast %120 : vector<17x1xf32> to vector<17x17xf32>
    %122 = arith.subf %118, %121 : vector<17x17xf32>
    %123 = math.exp %122 : vector<17x17xf32>
    %cst_36 = arith.constant dense<0.000000e+00> : vector<17xf32>
    %124 = vector.multi_reduction <add>, %123, %cst_36 [1] : vector<17x17xf32> to vector<17xf32>
    %125 = vector.shape_cast %124 : vector<17xf32> to vector<17x1xf32>
    %126 = tpu.reciprocal %125 {approx = true} : vector<17x1xf32> -> vector<17x1xf32>
    %127 = vector.broadcast %126 : vector<17x1xf32> to vector<17x17xf32>
    %128 = arith.mulf %123, %127 : vector<17x17xf32>
    %129 = arith.truncf %128 : vector<17x17xf32> to vector<17x17xbf16>
    %cst_37 = arith.constant dense<0.000000e+00> : vector<17x8xf32>
    %130 = tpu.matmul %129, %117, %cst_37 {dimension_numbers = #tpu.dot_dimension_numbers<[1], [0], [0], [1], [0, 0, 1, 1], [], []>} : vector<17x17xbf16>, vector<17x8xbf16>, vector<17x8xf32> -> vector<17x8xf32>
    %c17_38 = arith.constant 17 : index
    %c8_39 = arith.constant 8 : index
    %131 = vector.load %arg11[%c17_38, %c8_39] : memref<34x32xf32, #tpu.memory_space<vmem>>, vector<17x8xf32>
    tpu.vector_store %arg11[%c17_38, %c8_39], %130 {strides = array<i32>} : memref<34x32xf32, #tpu.memory_space<vmem>>, vector<17x8xf32>,
    %132 = vector.extract_strided_slice %11 {offsets = [17, 16], sizes = [17, 8], strides = [1, 1]} : vector<34x96xf32> to vector<17x8xf32>
    %133 = arith.truncf %132 : vector<17x8xf32> to vector<17x8xbf16>
    %134 = vector.extract_strided_slice %11 {offsets = [17, 48], sizes = [17, 8], strides = [1, 1]} : vector<34x96xf32> to vector<17x8xf32>
    %135 = arith.truncf %134 : vector<17x8xf32> to vector<17x8xbf16>
    %136 = vector.extract_strided_slice %11 {offsets = [17, 80], sizes = [17, 8], strides = [1, 1]} : vector<34x96xf32> to vector<17x8xf32>
    %137 = arith.truncf %136 : vector<17x8xf32> to vector<17x8xbf16>
    %cst_40 = arith.constant dense<0.000000e+00> : vector<17x17xf32>
    %138 = tpu.matmul %133, %135, %cst_40 {dimension_numbers = #tpu.dot_dimension_numbers<[1], [1], [0], [0], [0, 0, 1, 0], [], []>} : vector<17x8xbf16>, vector<17x8xbf16>, vector<17x17xf32> -> vector<17x17xf32>
    %cst_41 = arith.constant dense<0xFF800000> : vector<17xf32>
    %139 = vector.multi_reduction <maximumf>, %138, %cst_41 [1] : vector<17x17xf32> to vector<17xf32>
    %140 = vector.shape_cast %139 : vector<17xf32> to vector<17x1xf32>
    %141 = vector.broadcast %140 : vector<17x1xf32> to vector<17x17xf32>
    %142 = arith.subf %138, %141 : vector<17x17xf32>
    %143 = math.exp %142 : vector<17x17xf32>
    %cst_42 = arith.constant dense<0.000000e+00> : vector<17xf32>
    %144 = vector.multi_reduction <add>, %143, %cst_42 [1] : vector<17x17xf32> to vector<17xf32>
    %145 = vector.shape_cast %144 : vector<17xf32> to vector<17x1xf32>
    %146 = tpu.reciprocal %145 {approx = true} : vector<17x1xf32> -> vector<17x1xf32>
    %147 = vector.broadcast %146 : vector<17x1xf32> to vector<17x17xf32>
    %148 = arith.mulf %143, %147 : vector<17x17xf32>
    %149 = arith.truncf %148 : vector<17x17xf32> to vector<17x17xbf16>
    %cst_43 = arith.constant dense<0.000000e+00> : vector<17x8xf32>
    %150 = tpu.matmul %149, %137, %cst_43 {dimension_numbers = #tpu.dot_dimension_numbers<[1], [0], [0], [1], [0, 0, 1, 1], [], []>} : vector<17x17xbf16>, vector<17x8xbf16>, vector<17x8xf32> -> vector<17x8xf32>
    %c17_44 = arith.constant 17 : index
    %c16_45 = arith.constant 16 : index
    %151 = vector.load %arg11[%c17_44, %c16_45] : memref<34x32xf32, #tpu.memory_space<vmem>>, vector<17x8xf32>
    tpu.vector_store %arg11[%c17_44, %c16_45], %150 {strides = array<i32>} : memref<34x32xf32, #tpu.memory_space<vmem>>, vector<17x8xf32>,
    %152 = vector.extract_strided_slice %11 {offsets = [17, 24], sizes = [17, 8], strides = [1, 1]} : vector<34x96xf32> to vector<17x8xf32>
    %153 = arith.truncf %152 : vector<17x8xf32> to vector<17x8xbf16>
    %154 = vector.extract_strided_slice %11 {offsets = [17, 56], sizes = [17, 8], strides = [1, 1]} : vector<34x96xf32> to vector<17x8xf32>
    %155 = arith.truncf %154 : vector<17x8xf32> to vector<17x8xbf16>
    %156 = vector.extract_strided_slice %11 {offsets = [17, 88], sizes = [17, 8], strides = [1, 1]} : vector<34x96xf32> to vector<17x8xf32>
    %157 = arith.truncf %156 : vector<17x8xf32> to vector<17x8xbf16>
    %cst_46 = arith.constant dense<0.000000e+00> : vector<17x17xf32>
    %158 = tpu.matmul %153, %155, %cst_46 {dimension_numbers = #tpu.dot_dimension_numbers<[1], [1], [0], [0], [0, 0, 1, 0], [], []>} : vector<17x8xbf16>, vector<17x8xbf16>, vector<17x17xf32> -> vector<17x17xf32>
    %cst_47 = arith.constant dense<0xFF800000> : vector<17xf32>
    %159 = vector.multi_reduction <maximumf>, %158, %cst_47 [1] : vector<17x17xf32> to vector<17xf32>
    %160 = vector.shape_cast %159 : vector<17xf32> to vector<17x1xf32>
    %161 = vector.broadcast %160 : vector<17x1xf32> to vector<17x17xf32>
    %162 = arith.subf %158, %161 : vector<17x17xf32>
    %163 = math.exp %162 : vector<17x17xf32>
    %cst_48 = arith.constant dense<0.000000e+00> : vector<17xf32>
    %164 = vector.multi_reduction <add>, %163, %cst_48 [1] : vector<17x17xf32> to vector<17xf32>
    %165 = vector.shape_cast %164 : vector<17xf32> to vector<17x1xf32>
    %166 = tpu.reciprocal %165 {approx = true} : vector<17x1xf32> -> vector<17x1xf32>
    %167 = vector.broadcast %166 : vector<17x1xf32> to vector<17x17xf32>
    %168 = arith.mulf %163, %167 : vector<17x17xf32>
    %169 = arith.truncf %168 : vector<17x17xf32> to vector<17x17xbf16>
    %cst_49 = arith.constant dense<0.000000e+00> : vector<17x8xf32>
    %170 = tpu.matmul %169, %157, %cst_49 {dimension_numbers = #tpu.dot_dimension_numbers<[1], [0], [0], [1], [0, 0, 1, 1], [], []>} : vector<17x17xbf16>, vector<17x8xbf16>, vector<17x8xf32> -> vector<17x8xf32>
    %c17_50 = arith.constant 17 : index
    %c24_51 = arith.constant 24 : index
    %171 = vector.load %arg11[%c17_50, %c24_51] : memref<34x32xf32, #tpu.memory_space<vmem>>, vector<17x8xf32>
    tpu.vector_store %arg11[%c17_50, %c24_51], %170 {strides = array<i32>} : memref<34x32xf32, #tpu.memory_space<vmem>>, vector<17x8xf32>,
    %c0_52 = arith.constant 0 : index
    %c0_53 = arith.constant 0 : index
    %172 = vector.load %arg11[%c0_52, %c0_53] : memref<34x32xf32, #tpu.memory_space<vmem>>, vector<34x32xf32>
    %173 = arith.truncf %172 : vector<34x32xf32> to vector<34x32xbf16>
    %c0_54 = arith.constant 0 : index
    %c0_55 = arith.constant 0 : index
    %c0_56 = arith.constant 0 : index
    %174 = vector.load %arg4[%c0_54, %c0_55, %c0_56] : memref<1x32x32xbf16, #tpu.memory_space<vmem>>, vector<1x32x32xbf16>
    %175 = vector.shape_cast %174 : vector<1x32x32xbf16> to vector<32x32xbf16>
    %cst_57 = arith.constant dense<0.000000e+00> : vector<34x32xf32>
    %176 = tpu.matmul %173, %175, %cst_57 {dimension_numbers = #tpu.dot_dimension_numbers<[1], [0], [0], [1], [0, 0, 1, 1], [], []>} : vector<34x32xbf16>, vector<32x32xbf16>, vector<34x32xf32> -> vector<34x32xf32>
    %177 = arith.addf %3, %176 : vector<34x32xf32>
    %c0_58 = arith.constant 0 : index
    %c0_59 = arith.constant 0 : index
    %c0_60 = arith.constant 0 : index
    %178 = vector.load %arg5[%c0_58, %c0_59, %c0_60] : memref<1x1x32xf32, #tpu.memory_space<vmem>>, vector<1x1x32xf32>
    %179 = vector.shape_cast %178 : vector<1x1x32xf32> to vector<1x32xf32>
    %180 = vector.broadcast %179 : vector<1x32xf32> to vector<34x32xf32>
    %181 = arith.addf %177, %180 : vector<34x32xf32>
    %182 = arith.truncf %181 : vector<34x32xf32> to vector<34x32xbf16>
    %c0_61 = arith.constant 0 : index
    %c0_62 = arith.constant 0 : index
    %c0_63 = arith.constant 0 : index
    %183 = vector.load %arg6[%c0_61, %c0_62, %c0_63] : memref<1x32x128xbf16, #tpu.memory_space<vmem>>, vector<1x32x128xbf16>
    %184 = vector.shape_cast %183 : vector<1x32x128xbf16> to vector<32x128xbf16>
    %cst_64 = arith.constant dense<0.000000e+00> : vector<34x128xf32>
    %185 = tpu.matmul %182, %184, %cst_64 {dimension_numbers = #tpu.dot_dimension_numbers<[1], [0], [0], [1], [0, 0, 1, 1], [], []>} : vector<34x32xbf16>, vector<32x128xbf16>, vector<34x128xf32> -> vector<34x128xf32>
    %c0_65 = arith.constant 0 : index
    %c0_66 = arith.constant 0 : index
    %c0_67 = arith.constant 0 : index
    %186 = vector.load %arg7[%c0_65, %c0_66, %c0_67] : memref<1x1x128xf32, #tpu.memory_space<vmem>>, vector<1x1x128xf32>
    %187 = vector.shape_cast %186 : vector<1x1x128xf32> to vector<1x128xf32>
    %188 = vector.broadcast %187 : vector<1x128xf32> to vector<34x128xf32>
    %189 = arith.addf %185, %188 : vector<34x128xf32>
    %cst_68 = arith.constant 0.000000e+00 : f32
    %190 = vector.broadcast %cst_68 : f32 to vector<34x128xf32>
    %191 = arith.maximumf %189, %190 : vector<34x128xf32>
    %192 = arith.truncf %191 : vector<34x128xf32> to vector<34x128xbf16>
    %c0_69 = arith.constant 0 : index
    %c0_70 = arith.constant 0 : index
    %c0_71 = arith.constant 0 : index
    %193 = vector.load %arg8[%c0_69, %c0_70, %c0_71] : memref<1x128x32xbf16, #tpu.memory_space<vmem>>, vector<1x128x32xbf16>
    %194 = vector.shape_cast %193 : vector<1x128x32xbf16> to vector<128x32xbf16>
    %cst_72 = arith.constant dense<0.000000e+00> : vector<34x32xf32>
    %195 = tpu.matmul %192, %194, %cst_72 {dimension_numbers = #tpu.dot_dimension_numbers<[1], [0], [0], [1], [0, 0, 1, 1], [], []>} : vector<34x128xbf16>, vector<128x32xbf16>, vector<34x32xf32> -> vector<34x32xf32>
    %196 = arith.addf %181, %195 : vector<34x32xf32>
    %c0_73 = arith.constant 0 : index
    %c0_74 = arith.constant 0 : index
    %c0_75 = arith.constant 0 : index
    %197 = vector.load %arg9[%c0_73, %c0_74, %c0_75] : memref<1x1x32xf32, #tpu.memory_space<vmem>>, vector<1x1x32xf32>
    %198 = vector.shape_cast %197 : vector<1x1x32xf32> to vector<1x32xf32>
    %199 = vector.broadcast %198 : vector<1x32xf32> to vector<34x32xf32>
    %200 = arith.addf %196, %199 : vector<34x32xf32>
    %c0_76 = arith.constant 0 : index
    %c0_77 = arith.constant 0 : index
    %201 = vector.load %arg10[%c0_76, %c0_77] : memref<34x32xf32, #tpu.memory_space<vmem>>, vector<34x32xf32>
    tpu.vector_store %arg10[%c0_76, %c0_77], %200 {strides = array<i32>} : memref<34x32xf32, #tpu.memory_space<vmem>>, vector<34x32xf32>,
    return
  }
  func.func @transform_0(%arg0: i32) -> (i32, i32) {
    %c0_i32 = arith.constant 0 : i32
    %c0_i32_0 = arith.constant 0 : i32
    %c0_i32_1 = arith.constant 0 : i32
    return %c0_i32, %c0_i32_0 : i32, i32
  }
  func.func @transform_1(%arg0: i32) -> (i32, i32, i32) {
    %c0_i32 = arith.constant 0 : i32
    %c0_i32_0 = arith.constant 0 : i32
    %c0_i32_1 = arith.constant 0 : i32
    return %arg0, %c0_i32, %c0_i32_0 : i32, i32, i32
  }
  func.func @transform_2(%arg0: i32) -> (i32, i32, i32) {
    %c0_i32 = arith.constant 0 : i32
    %c0_i32_0 = arith.constant 0 : i32
    %c0_i32_1 = arith.constant 0 : i32
    return %arg0, %c0_i32, %c0_i32_0 : i32, i32, i32
  }
  func.func @transform_3(%arg0: i32) -> (i32, i32, i32) {
    %c0_i32 = arith.constant 0 : i32
    %c0_i32_0 = arith.constant 0 : i32
    %c0_i32_1 = arith.constant 0 : i32
    return %arg0, %c0_i32, %c0_i32_0 : i32, i32, i32
  }
  func.func @transform_4(%arg0: i32) -> (i32, i32, i32) {
    %c0_i32 = arith.constant 0 : i32
    %c0_i32_0 = arith.constant 0 : i32
    %c0_i32_1 = arith.constant 0 : i32
    return %arg0, %c0_i32, %c0_i32_0 : i32, i32, i32
  }
  func.func @transform_5(%arg0: i32) -> (i32, i32, i32) {
    %c0_i32 = arith.constant 0 : i32
    %c0_i32_0 = arith.constant 0 : i32
    %c0_i32_1 = arith.constant 0 : i32
    return %arg0, %c0_i32, %c0_i32_0 : i32, i32, i32
  }
  func.func @transform_6(%arg0: i32) -> (i32, i32, i32) {
    %c0_i32 = arith.constant 0 : i32
    %c0_i32_0 = arith.constant 0 : i32
    %c0_i32_1 = arith.constant 0 : i32
    return %arg0, %c0_i32, %c0_i32_0 : i32, i32, i32
  }
  func.func @transform_7(%arg0: i32) -> (i32, i32, i32) {
    %c0_i32 = arith.constant 0 : i32
    %c0_i32_0 = arith.constant 0 : i32
    %c0_i32_1 = arith.constant 0 : i32
    return %arg0, %c0_i32, %c0_i32_0 : i32, i32, i32
  }
  func.func @transform_8(%arg0: i32) -> (i32, i32, i32) {
    %c0_i32 = arith.constant 0 : i32
    %c0_i32_0 = arith.constant 0 : i32
    %c0_i32_1 = arith.constant 0 : i32
    return %arg0, %c0_i32, %c0_i32_0 : i32, i32, i32
  }
  func.func @transform_9(%arg0: i32) -> (i32, i32) {
    %c0_i32 = arith.constant 0 : i32
    %c0_i32_0 = arith.constant 0 : i32
    %c0_i32_1 = arith.constant 0 : i32
    return %c0_i32, %c0_i32_0 : i32, i32
  }
}

</mosaic_0001>

<bundles_post_ra>
// kernel: transformer_forward.1
= control target key start
LH: loop header
LB: loop body
LE: loop exit
PB: predicated region body
PF: predicated region fallthrough
CT: control target
= control target key end

     0   :  { %s3041_s30 = smov 0   ;;  %s3602_s0 = inlined_call_operand.vmem [shape: f32[34,32], index: 0, kind: input, shape index: {}, may-alias: {0,9}]   ;;  %s3603_s1 = inlined_call_operand.vmem [shape: bf16[2,32,96], index: 1, kind: input, shape index: {}]   ;;  %s3604_s2 = inlined_call_operand.vmem [shape: f32[2,1,96], index: 2, kind: input, shape index: {}]   ;;  %s3605_s3 = inlined_call_operand.vmem [shape: bf16[2,32,32], index: 3, kind: input, shape index: {}]   ;;  %s3606_s4 = inlined_call_operand.vmem [shape: f32[2,1,32], index: 4, kind: input, shape index: {}]   ;;  %s3607_s5 = inlined_call_operand.vmem [shape: bf16[2,32,128], index: 5, kind: input, shape index: {}]   ;;  %s3608_s6 = inlined_call_operand.vmem [shape: f32[2,1,128], index: 6, kind: input, shape index: {}]   ;;  %s3609_s7 = inlined_call_operand.vmem [shape: bf16[2,128,32], index: 7, kind: input, shape index: {}]   ;;  %s3610_s8 = inlined_call_operand.vmem [shape: f32[2,1,32], index: 8, kind: input, shape index: {}]   ;;  %s3611_s9 = inlined_call_operand.vmem [shape: f32[34,32], index: 9, kind: output, shape index: {}, may-alias: {0,9}]  }
   0x1 LB: > { %s2438_s10 = sadd.s32 4294967295, %s2972_s30   ;;  %p2441_p0 = scmp.ge.s32.totalorder %s2972_s30, 1  ;;  %s2972_s30 = sphi %s3041_s30, %s19_s30  }
   0x2   : > { %p344_p1 = scmp.lt.s32.totalorder %s2972_s30, 3 }
   0x4   : > { %p345_p2 = pnand %p2441_p0, %p344_p1 }
   0x5   : > { %p402_p3 = scmp.lt.s32.totalorder (!%p345_p2), %s2438_s10, 1  ;;  %p2450_p4 = scmp.ne.s32.totalorder (!%p345_p2), %s2438_s10, 0 }
   0x6   : > { %348 = sbr.rel (%p345_p2) target bundleno = 4763 (0x129b), region = 56 }
   0xd   : > { %s3049_s11 = scalar_select %p402_p3, %s2438_s10, 1 }
   0xe   : > { %438 = sbr.rel (%p2450_p4) target bundleno = 26 (0x1a), region = 60  ;;  %v439_v0 = vld [vmem:[%s3602_s0] sm:$0xff] (!%p2450_p4)  ;;  %vm444_vm0 = vcmask (!%p2450_p4), 261120   ;;  %v440_v1 = vld [vmem:[%s3602_s0 + $0x8] sm:$0xff] (!%p2450_p4)  ;;  %v441_v2 = vld [vmem:[%s3602_s0 + $0x10] sm:$0xff] (!%p2450_p4)  ;;  %vm449_vm1 = vcmask (!%p2450_p4), 254976  }
   0xf   : > { %s2512_s12 = sshll.u32 %s3049_s11, 4  ;;  %s417_s24 = scalar_lea.vmem %s3606_s4, %s3049_s11  ;;  %445 = vst.msk [vmem:[%s3611_s9] sm:$0xff] (!%p2450_p4), %vm444_vm0, %v439_v0  ;;  %446 = vst.msk [vmem:[%s3611_s9 + $0x8] sm:$0xff] (!%p2450_p4), %vm444_vm0, %v440_v1 }
  0x10   : > { %s406_s18 = scalar_lea.vmem %s3603_s1, %s2512_s12  ;;  %s3062_s21 = scalar_lea.vmem %s3605_s3, %s2512_s12  ;;  %447 = vst.msk [vmem:[%s3611_s9 + $0x10] sm:$0xff] (!%p2450_p4), %vm444_vm0, %v441_v2 }
  0x11   : > { %s3071_s27 = scalar_lea.vmem %s3607_s5, %s2512_s12  ;;  %s425_s13 = scalar_lea.vmem %s3608_s6, %s3049_s11 }
  0x12   : > { %s2515_s14 = sshll.u32 %s3049_s11, 6  ;;  %s433_s22 = scalar_lea.vmem %s3610_s8, %s3049_s11 }
  0x13   : > { %s3081_s19 = scalar_lea.vmem %s3609_s7, %s2515_s14 }
  0x17   : > { %v442_v3 = vld [vmem:[%s3602_s0 + $0x18] sm:$0xff]  ;;  %v443_v4 = vld [vmem:[%s3602_s0 + $0x20] sm:$0x3] }
  0x18   : > { %448 = vst.msk [vmem:[%s3611_s9 + $0x18] sm:$0xff] %vm444_vm0, %v442_v3 }
  0x19   : > { %450 = vst.msk [vmem:[%s3611_s9 + $0x20] sm:$0x3] %vm449_vm1, %v443_v4 }
  0x1a PF: > { %v2851_v5 = vld [vmem:[%s406_s18] sm:$0xff]   ;;  %v2974_v6 = vmov 0.0   ;;  %v2852_v7 = vld [vmem:[%s406_s18 + $0x8] sm:$0xff]   ;;  %vm2975_vm2 = vmmov 0   ;;  %vm482_vm3 = vcmask 261120   ;;  %s3612_s16 = scalar_lea.vmem %s3604_s2, %s3049_s11  ;;  %vm556_vm4 = vcmask 64512  }
  0x1b   : > { %2606 = vmatprep.subr.bf16.mxu1 %v2974_v6  ;;  %2610 = vmatprep.mubr.msk.bf16.mxu1 %vm2975_vm2, %v2974_v6  ;;  %v451_v8 = vld [vmem:[%s3611_s9] sm:$0xff]  ;;  %v452_v9 = vld [vmem:[%s3611_s9 + $0x8] sm:$0xff]  ;;  %s2976_s10 = smov 96   ;;  %s2977_s15 = smov 88   ;;  %vm1271_vm5 = vsmask.f32 7424 }
  0x1c   : > { %2607 = vmatpush3.bf16.msra.mxu1 %v2851_v5  ;;  %v456_v10 = vpack.c.bf16 %v452_v9, %v451_v8  ;;  %v453_v11 = vld [vmem:[%s3611_s9 + $0x10] sm:$0xff]  ;;  %v2451_v16 = vld [vmem:[%s3612_s16] ss:$0 sm:$0xff]  ;;  %s2978_s17 = smov 120   ;;  %s2979_s20 = smov 80   ;;  %vm617_vm6 = vcmask 138240  }
  0x1d   : > { %2608 = vmatprep.subr.bf16.mxu1 %v2974_v6  ;;  %s2980_s23 = smov 112   ;;  %vm624_vm7 = vcmask 131072   ;;  %s2981_s18 = smov 64   ;;  %vm665_vm8 = vcmask 1040384   ;;  %vm721_vm9 = vcmask 57344   ;;  %vm900_vm10 = vcmask 130112  }
  0x1e   : > { %s2982_s25 = smov 56   ;;  %s2984_s12 = smov 48   ;;  %vm1082_vm11 = vcmask 195712   ;;  %vm1264_vm12 = vcmask 261312   ;;  %vm903_vm13 = vcmask 122944   ;;  %vm1085_vm14 = vcmask 188544  }
  0x1f   : > { %v454_v12 = vld [vmem:[%s3611_s9 + $0x18] sm:$0xff]  ;;  %s2985_s26 = smov 72   ;;  %s2986_s28 = smov 104   ;;  %vm1267_vm15 = vcmask 254144   ;;  %vm2336_vm0 = vcmask 254976  }
  0x20   : > { %2609 = vmatpush3.bf16.msra.mxu1 %v2852_v7  ;;  %v457_v13 = vpack.c.bf16 %v454_v12, %v453_v11  ;;  %v455_v14 = vld [vmem:[%s3611_s9 + $0x20] sm:$0x3]  ;;  %s2987_s29 = smov 40   ;;  %s2988_s14 = smov 8  }
  0x21   : > { %v458_v15 = vpack.c.bf16 %v455_v14, %v455_v14  ;;  %s2989_s16 = smov 16  }
  0x23   : > { %2611 = vmatmul.mubr.msk.bf16.vlgmr.msra.gmra.mrb[0].mxu1 %vm482_vm3, %v456_v10 }
  0x24   : > { %2614 = vmatprep.mubr.msk.bf16.mxu1 %vm2975_vm2, %v2974_v6 }
  0x2b   : > { %2615 = vmatmul.mubr.msk.bf16.gmra.mrb[4].mxu1 %vm482_vm3, %v457_v13 }
  0x2c   : > { %2618 = vmatprep.mubr.msk.bf16.mxu1 %vm2975_vm2, %v2974_v6 }
  0x33   : > { %2619 = vmatmul.mubr.msk.bf16.gmra.mrb[8].mxu1 %vm482_vm3, %v458_v15 }
  0xf6   : > { %v526_v17 = vpop.f32.mrb[0].mxu1 }
  0xf7   : > { %v2612_v18 = vpop.f32.mrb[1].mxu1  ;;  %v527_v20 = vadd.f32 %v2451_v16, %v526_v17 }
  0xf8   : > { %v529_v19 = vpop.f32.mrb[2].mxu1 }
  0xf9   : > { %v530_v21 = vadd.f32 %v2451_v16, %v529_v19  ;;  %v2613_v22 = vpop.f32.mrb[3].mxu1 }
  0xfb   : > { %v3148_v23 = vpack.c.bf16 %v530_v21, %v527_v20 }
  0xfd   : > { %552 = vrot.lane.b32.xlu0 %v3148_v23, %s2976_s10  ;;  %2626 = vmatprep.mubr.msk.bf16.mxu1 %vm556_vm4, %v3148_v23 }
  0xfe   : > { %v534_v24 = vpop.f32.mrb[4].mxu1 }
  0xff   : > { %v535_v25 = vadd.f32 %v2451_v16, %v534_v24  ;;  %v2616_v26 = vpop.f32.mrb[5].mxu1 }
 0x100   : > { %v537_v27 = vpop.f32.mrb[6].mxu1 }
 0x101   : > { %v3154_v28 = vpack.c.bf16 %v535_v25, %v535_v25  ;;  %727 = vrot.lane.b32.xlu0 %v3148_v23, %s2977_s15  ;;  %v538_v29 = vadd.f32 %v2451_v16, %v537_v27  ;;  %v2617_v30 = vpop.f32.mrb[7].mxu1 }
 0x103   : > { %v1269_v31 = vpack.c.bf16 %v538_v29, %v535_v25  ;;  %554 = vrot.lane.b32.xlu1 %v3154_v28, %s2976_s10 }
 0x105   : > { %v1275_v32 = vshll.u32 %v1269_v31, 16  ;;  %723 = vrot.lane.b32.xlu0 %v3148_v23, %s2978_s17  ;;  %v1273_v40 = vshrl.u32 %v1269_v31, 16 }
 0x106   : > { %v542_v33 = vpop.f32.mrb[8].mxu1 }
 0x107   : > { %v543_v34 = vadd.f32 %v2451_v16, %v542_v33  ;;  %729 = vrot.lane.b32.xlu1 %v3154_v28, %s2977_s15  ;;  %v2620_v35 = vpop.f32.mrb[9].mxu1  ;;  %v1277_v37 = vrot.slane %v1275_v32, 1 }
 0x108   : > { %v545_v36 = vpop.f32.mrb[10].mxu1 }
 0x109   : > { %v3164_v38 = vpack.c.bf16 %v543_v34, %v543_v34  ;;  %725 = vrot.lane.b32.xlu0 %v3154_v28, %s2978_s17  ;;  %v2621_v39 = vpop.f32.mrb[11].mxu1  ;;  %v1278_v42 = vor.u32 %v1277_v37, %v1273_v40 }
 0x10b   : > { %v1280_v41 = vshll.u32 %v3164_v38, 16  ;;  %909 = vrot.lane.b32.xlu1 %v3148_v23, %s2979_s20 }
 0x10d   : > { %v1282_v43 = vrot.slane %v1280_v41, 1  ;;  %905 = vrot.lane.b32.xlu0 %v3148_v23, %s2980_s23 }
 0x10f   : > { %v3173_v44 = vsel %vm1271_vm5, %v1278_v42, %v1282_v43  ;;  %911 = vrot.lane.b32.xlu1 %v3154_v28, %s2979_s20 }
 0x113   : > { %907 = vrot.lane.b32.xlu1 %v3154_v28, %s2980_s23 }
 0x16f   : > { %v553_v45 = vpop.permute.xlu0 %552 }
 0x170   : > { %2810 = vmatprep.subr.msk.bf16.mxu1 %vm556_vm4, %v553_v45  ;;  %v564_v46 = vsel %vm556_vm4, %v553_v45, 0 }
 0x171   : > { %2623 = vmatpush3.bf16.xpose.msra.mxu1 %v564_v46 }
 0x173   : > { %v728_v47 = vpop.permute.xlu0 %727 }
 0x174   : > { %2812 = vmatprep.subr.msk.bf16.mxu0 %vm556_vm4, %v728_v47  ;;  %v738_v48 = vsel %vm556_vm4, %v728_v47, 0 }
 0x175   : > { %2639 = vmatpush3.bf16.xpose.msra.mxu0 %v738_v48  ;;  %v555_v49 = vpop.permute.xlu1 %554 }
 0x176   : > { %2811 = vmatprep.subr.msk.bf16.mxu1 %vm556_vm4, %v555_v49  ;;  %v567_v50 = vsel %vm556_vm4, %v555_v49, 0  ;;  %v2983_v49 = vmov 0  }
 0x177   : > { %v724_v51 = vpop.permute.xlu0 %723 }
 0x178   : > { %2642 = vmatprep.mubr.msk.bf16.mxu0 %vm556_vm4, %v724_v51 }
 0x179   : > { %2625 = vmatpush3.bf16.xpose.msra.mxu1 %v567_v50  ;;  %v730_v52 = vpop.permute.xlu1 %729  ;;  %v3226_v50 = vsel %vm665_vm8, 65535, %v2983_v49 }
 0x17a   : > { %2813 = vmatprep.subr.msk.bf16.mxu0 %vm556_vm4, %v730_v52  ;;  %v741_v53 = vsel %vm556_vm4, %v730_v52, 0 }
 0x17b   : > { %v726_v55 = vpop.permute.xlu0 %725 }
 0x17d   : > { %2641 = vmatpush3.bf16.xpose.msra.mxu0 %v741_v53  ;;  %v910_v54 = vpop.permute.xlu1 %909 }
 0x17e   : > { %2814 = vmatprep.subr.msk.bf16.mxu0 %vm556_vm4, %v910_v54  ;;  %v920_v57 = vsel %vm556_vm4, %v910_v54, 0 }
 0x17f   : > { %v906_v56 = vpop.permute.xlu0 %905 }
 0x180   : > { %2627 = vmatmul.mubr.msk.bf16.vlgmr.msra.gmra.mrb[12].mxu1 %vm556_vm4, %v3154_v28 }
 0x181   : > { %v912_v58 = vpop.permute.xlu1 %911 }
 0x182   : > { %v923_v59 = vsel %vm556_vm4, %v912_v58, 0 }
 0x184   : > { %2643 = vmatmul.mubr.msk.bf16.vlgmr.msra.gmra.mrb[0].mxu0 %vm556_vm4, %v726_v55 }
 0x185   : > { %2655 = vmatpush3.bf16.xpose.msra.mxu0 %v920_v57  ;;  %2658 = vmatprep.mubr.msk.bf16.mxu0 %vm556_vm4, %v906_v56  ;;  %v908_v60 = vpop.permute.xlu1 %907 }
 0x186   : > { %2815 = vmatprep.subr.msk.bf16.mxu0 %vm556_vm4, %v912_v58 }
 0x18d   : > { %2657 = vmatpush3.bf16.xpose.msra.mxu0 %v923_v59 }
 0x194   : > { %2659 = vmatmul.mubr.msk.bf16.vlgmr.msra.gmra.mrb[4].mxu0 %vm556_vm4, %v908_v60 }
 0x253   : > { %v2628_v61 = vpop.f32.mrb[12].mxu1 }
 0x254   : > { %v603_v62 = vpop.f32.mrb[13].mxu1  ;;  %v625_v7 = vsel %vm624_vm7, %v2628_v61, -inf }
 0x255   : > { %v2629_v63 = vpop.f32.mrb[14].mxu1  ;;  %v618_v0 = vsel %vm617_vm6, %v603_v62, -inf }
 0x256   : > { %619 = vmax.xlane.f32.xlu0 %v618_v0  ;;  %v606_v1 = vpop.f32.mrb[15].mxu1 }
 0x257   : > { %v2644_v2 = vpop.f32.mrb[0].mxu0  ;;  %v621_v3 = vsel %vm617_vm6, %v606_v1, -inf }
 0x258   : > { %v777_v4 = vpop.f32.mrb[1].mxu0  ;;  %622 = vmax.xlane.f32.xlu1 %v621_v3  ;;  %v797_v11 = vsel %vm624_vm7, %v2644_v2, -inf }
 0x259   : > { %v2645_v5 = vpop.f32.mrb[2].mxu0  ;;  %v791_v10 = vsel %vm617_vm6, %v777_v4, -inf }
 0x25a   : > { %v3200_v8 = vpop.f32.mrb[3].mxu0  ;;  %626 = vmax.xlane.f32.xlu0 %v625_v7 }
 0x25b   : > { %v794_v9 = vsel %vm617_vm6, %v3200_v8, -inf }
 0x25c   : > { %795 = vmax.xlane.f32.xlu1 %v794_v9 }
 0x25e   : > { %792 = vmax.xlane.f32.xlu0 %v791_v10 }
 0x262   : > { %798 = vmax.xlane.f32.xlu0 %v797_v11 }
 0x267   : > { %v2660_v12 = vpop.f32.mrb[4].mxu0 }
 0x268   : > { %v959_v13 = vpop.f32.mrb[5].mxu0  ;;  %v979_v14 = vsel %vm624_vm7, %v2660_v12, -inf }
 0x269   : > { %v2661_v15 = vpop.f32.mrb[6].mxu0  ;;  %980 = vmax.xlane.f32.xlu1 %v979_v14  ;;  %v973_v17 = vsel %vm617_vm6, %v959_v13, -inf }
 0x26a   : > { %v3207_v16 = vpop.f32.mrb[7].mxu0 }
 0x26b   : > { %v976_v18 = vsel %vm617_vm6, %v3207_v16, -inf }
 0x26d   : > { %974 = vmax.xlane.f32.xlu1 %v973_v17 }
 0x278   : > { %654 = vrot.lane.b32.xlu0 %v3148_v23, %s2981_s18 }
 0x27e   : > { %656 = vrot.lane.b32.xlu1 %v3154_v28, %s2981_s18 }
 0x297   : > { %977 = vmax.xlane.f32.xlu0 %v976_v18 }
 0x2ad   : > { %826 = vrot.lane.b32.xlu0 %v3148_v23, %s2982_s25 }
 0x2e3   : > { %v620_v19 = vpop.xlane.xlu0 %619 }
 0x2e4   : > { %v628_v20 = vsub.f32 %v603_v62, %v620_v19 }
 0x2e5   : > { %v623_v27 = vpop.xlane.xlu1 %622 }
 0x2e6   : > { %v631_v24 = vmul.f32 1.442695, %v628_v20  ;;  %v629_v32 = vsub.f32 %v606_v1, %v623_v27 }
 0x2e7   : > { %v627_v21 = vpop.xlane.xlu0 %626 }
 0x2e8   : > { %v630_v22 = vsub.f32 %v2628_v61, %v627_v21  ;;  %v633_v39 = vmul.f32 1.442695, %v629_v32 }
 0x2e9   : > { %v796_v33 = vpop.xlane.xlu1 %795 }
 0x2ea   : > { %v635_v25 = vmul.f32 1.442695, %v630_v22  ;;  %v801_v0 = vsub.f32 %v3200_v8, %v796_v33 }
 0x2eb   : > { %v793_v26 = vpop.xlane.xlu0 %792 }
 0x2ec   : > { %2865 = vpow2.f32 %v635_v25  ;;  %v800_v29 = vsub.f32 %v777_v4, %v793_v26  ;;  %v805_v1 = vmul.f32 1.442695, %v801_v0 }
 0x2ed   : > { %2867 = vpow2.f32 %v631_v24 }
 0x2ee   : > { %v803_v34 = vmul.f32 1.442695, %v800_v29 }
 0x2ef   : > { %v799_v30 = vpop.xlane.xlu0 %798 }
 0x2f0   : > { %v802_v31 = vsub.f32 %v2644_v2, %v799_v30 }
 0x2f2   : > { %v807_v35 = vmul.f32 1.442695, %v802_v31 }
 0x2f3   : > { %v655_v36 = vpop.permute.xlu0 %654 }
 0x2f4   : > { %2869 = vpow2.f32 %v807_v35  ;;  %2630 = vmatprep.subr.bf16.mxu1 %v655_v36 }
 0x2f5   : > { %2631 = vmatpush3.bf16.msra.mxu1 %v655_v36  ;;  %2871 = vpow2.f32 %v803_v34 }
 0x2f6   : > { %v3218_v37 = vpop.eup %2865  ;;  %v981_v40 = vpop.xlane.xlu1 %980  ;;  %2873 = vpow2.f32 %v633_v39 }
 0x2f7   : > { %v984_v41 = vsub.f32 %v2660_v12, %v981_v40  ;;  %v643_v42 = vsel %vm624_vm7, %v3218_v37, 0.0  ;;  %v3222_v43 = vpop.eup %2867 }
 0x2f8   : > { %644 = vadd.xlane.f32.xlu0 %v643_v42  ;;  %v637_v48 = vsel %vm617_vm6, %v3222_v43, 0.0 }
 0x2f9   : > { %v989_v45 = vmul.f32 1.442695, %v984_v41 }
 0x2fa   : > { %v975_v46 = vpop.xlane.xlu1 %974 }
 0x2fb   : > { %v982_v47 = vsub.f32 %v959_v13, %v975_v46  ;;  %2875 = vpow2.f32 %v989_v45 }
 0x2fc   : > { %638 = vadd.xlane.f32.xlu0 %v637_v48 }
 0x2fd   : > { %v985_v52 = vmul.f32 1.442695, %v982_v47 }
 0x2fe   : > { %v3228_v51 = vpop.eup %2869  ;;  %v657_v53 = vpop.permute.xlu1 %656 }
 0x2ff   : > { %v669_v54 = vand.u32 %v3226_v50, %v657_v53  ;;  %v815_v55 = vsel %vm624_vm7, %v3228_v51, 0.0  ;;  %v3233_v56 = vpop.eup %2871  ;;  %2877 = vpow2.f32 %v985_v52 }
 0x300   : > { %816 = vadd.xlane.f32.xlu1 %v815_v55  ;;  %v809_v57 = vsel %vm617_vm6, %v3233_v56, 0.0  ;;  %v2874_v58 = vpop.eup %2873  ;;  %2879 = vpow2.f32 %v805_v1 }
 0x301   : > { %2632 = vmatprep.subr.bf16.mxu1 %v669_v54  ;;  %v640_v59 = vsel %vm617_vm6, %v2874_v58, 0.0 }
 0x302   : > { %2633 = vmatpush3.bf16.msra.mxu1 %v669_v54 }
 0x304   : > { %810 = vadd.xlane.f32.xlu1 %v809_v57 }
 0x305   : > { %v3238_v60 = vpop.eup %2875 }
 0x306   : > { %v997_v61 = vsel %vm624_vm7, %v3238_v60, 0.0 }
 0x308   : > { %641 = vadd.xlane.f32.xlu1 %v640_v59 }
 0x309   : > { %v3242_v62 = vpop.eup %2877 }
 0x30a   : > { %v991_v63 = vsel %vm617_vm6, %v3242_v62, 0.0  ;;  %v2880_v7 = vpop.eup %2879 }
 0x30b   : > { %v812_v9 = vsel %vm617_vm6, %v2880_v7, 0.0 }
 0x30c   : > { %998 = vadd.xlane.f32.xlu1 %v997_v61 }
 0x310   : > { %992 = vadd.xlane.f32.xlu1 %v991_v63 }
 0x312   : > { %828 = vrot.lane.b32.xlu0 %v3154_v28, %s2982_s25 }
 0x324   : > { %v978_v2 = vpop.xlane.xlu0 %977 }
 0x325   : > { %v983_v3 = vsub.f32 %v3207_v16, %v978_v2 }
 0x327   : > { %v987_v4 = vmul.f32 1.442695, %v983_v3 }
 0x328   : > { %v827_v5 = vpop.permute.xlu0 %826 }
 0x329   : > { %2881 = vpow2.f32 %v987_v4  ;;  %2646 = vmatprep.subr.bf16.mxu1 %v827_v5 }
 0x331   : > { %813 = vadd.xlane.f32.xlu0 %v812_v9 }
 0x333   : > { %v2882_v10 = vpop.eup %2881 }
 0x334   : > { %v994_v11 = vsel %vm617_vm6, %v2882_v10, 0.0 }
 0x335   : > { %995 = vadd.xlane.f32.xlu1 %v994_v11 }
 0x346   : > { %1010 = vrot.lane.b32.xlu1 %v3154_v28, %s2984_s12 }
 0x347   : > { %1008 = vrot.lane.b32.xlu0 %v3148_v23, %s2984_s12 }
 0x34a   : > { %1093 = vrot.lane.b32.xlu1 %v3154_v28, %s2985_s26 }
 0x34b   : > { %1091 = vrot.lane.b32.xlu0 %v3148_v23, %s2985_s26 }
 0x34e   : > { %1089 = vrot.lane.b32.xlu1 %v3154_v28, %s2986_s28 }
 0x34f   : > { %1087 = vrot.lane.b32.xlu0 %v3148_v23, %s2986_s28 }
 0x385   : > { %v645_v8 = vpop.xlane.xlu0 %644 }
 0x386   : > { %2883 = vrcp.f32 %v645_v8 }
 0x389   : > { %v639_v13 = vpop.xlane.xlu0 %638 }
 0x38a   : > { %2885 = vrcp.f32 %v639_v13 }
 0x38d   : > { %v817_v12 = vpop.xlane.xlu1 %816  ;;  %v829_v22 = vpop.permute.xlu0 %828 }
 0x38e   : > { %v838_v26 = vand.u32 %v829_v22, %v3226_v50 }
 0x390   : > { %v2884_v16 = vpop.eup %2883 }
 0x391   : > { %v811_v14 = vpop.xlane.xlu1 %810  ;;  %v651_v19 = vmul.f32 %v2884_v16, %v3218_v37 }
 0x393   : > { %v653_v25 = vpack.c.bf16 %v651_v19, %v651_v19 }
 0x394   : > { %v2886_v17 = vpop.eup %2885 }
 0x395   : > { %v642_v15 = vpop.xlane.xlu1 %641  ;;  %v649_v20 = vmul.f32 %v2886_v17, %v3222_v43 }
 0x396   : > { %2887 = vrcp.f32 %v642_v15 }
 0x397   : > { %2889 = vrcp.f32 %v817_v12 }
 0x398   : > { %2891 = vrcp.f32 %v811_v14 }
 0x399   : > { %v999_v27 = vpop.xlane.xlu1 %998 }
 0x39d   : > { %v993_v29 = vpop.xlane.xlu1 %992 }
 0x3a0   : > { %v2888_v18 = vpop.eup %2887 }
 0x3a1   : > { %v650_v21 = vmul.f32 %v2888_v18, %v2874_v58  ;;  %v2890_v33 = vpop.eup %2889 }
 0x3a2   : > { %v2892_v34 = vpop.eup %2891  ;;  %v823_v36 = vmul.f32 %v2890_v33, %v3228_v51  ;;  %v3310_v33 = vshrl.u32 %v3164_v38, 16 }
 0x3a3   : > { %v652_v24 = vpack.c.bf16 %v650_v21, %v649_v20  ;;  %v821_v37 = vmul.f32 %v2892_v34, %v3233_v56 }
 0x3a4   : > { %v825_v45 = vpack.c.bf16 %v823_v36, %v823_v36 }
 0x3a5   : > { %2634 = vmatprep.mubr.msk.bf16.mxu1 %vm617_vm6, %v652_v24 }
 0x3a6   : > { %2635 = vmatmul.mubr.msk.bf16.vlgmr.msra.gmra.mrb[16].mxu1 %vm617_vm6, %v653_v25 }
 0x3a7   : > { %2647 = vmatpush3.bf16.msra.mxu1 %v827_v5 }
 0x3a8   : > { %2648 = vmatprep.subr.bf16.mxu1 %v838_v26 }
 0x3ab   : > { %2649 = vmatpush3.bf16.msra.mxu1 %v838_v26 }
 0x3be   : > { %v814_v30 = vpop.xlane.xlu0 %813 }
 0x3bf   : > { %2893 = vrcp.f32 %v814_v30 }
 0x3c0   : > { %2895 = vrcp.f32 %v993_v29 }
 0x3c2   : > { %v1009_v31 = vpop.permute.xlu0 %1008  ;;  %v996_v32 = vpop.xlane.xlu1 %995 }
 0x3c3   : > { %2897 = vrcp.f32 %v996_v32  ;;  %2662 = vmatprep.subr.bf16.mxu1 %v1009_v31 }
 0x3c4   : > { %2899 = vrcp.f32 %v999_v27 }
 0x3c6   : > { %v1011_v41 = vpop.permute.xlu1 %1010  ;;  %v1092_v53 = vpop.permute.xlu0 %1091 }
 0x3c7   : > { %v1020_v49 = vand.u32 %v1011_v41, %v3226_v50  ;;  %v1102_v56 = vsel %vm556_vm4, %v1092_v53, 0 }
 0x3c9   : > { %v2894_v35 = vpop.eup %2893 }
 0x3ca   : > { %v822_v39 = vmul.f32 %v2894_v35, %v2880_v7  ;;  %v2896_v40 = vpop.eup %2895  ;;  %v1088_v55 = vpop.permute.xlu0 %1087 }
 0x3cb   : > { %v1003_v47 = vmul.f32 %v2896_v40, %v3242_v62  ;;  %v1094_v57 = vpop.permute.xlu1 %1093 }
 0x3cc   : > { %v824_v42 = vpack.c.bf16 %v822_v39, %v821_v37  ;;  %v1105_v58 = vsel %vm556_vm4, %v1094_v57, 0 }
 0x3cd   : > { %v2898_v43 = vpop.eup %2897 }
 0x3ce   : > { %v2900_v46 = vpop.eup %2899  ;;  %2650 = vmatprep.mubr.msk.bf16.mxu1 %vm617_vm6, %v824_v42  ;;  %v1004_v48 = vmul.f32 %v2898_v43, %v2882_v10 }
 0x3cf   : > { %2651 = vmatmul.mubr.msk.bf16.vlgmr.msra.gmra.mrb[20].mxu1 %vm617_vm6, %v825_v45  ;;  %v1005_v52 = vmul.f32 %v2900_v46, %v3238_v60  ;;  %v1090_v59 = vpop.permute.xlu1 %1089 }
 0x3d0   : > { %2663 = vmatpush3.bf16.msra.mxu1 %v1009_v31  ;;  %v1006_v51 = vpack.c.bf16 %v1004_v48, %v1003_v47 }
 0x3d1   : > { %2664 = vmatprep.subr.bf16.mxu1 %v1020_v49  ;;  %v1007_v54 = vpack.c.bf16 %v1005_v52, %v1005_v52 }
 0x3d2   : > { %2666 = vmatprep.mubr.msk.bf16.mxu1 %vm617_vm6, %v1006_v51 }
 0x3d4   : > { %2665 = vmatpush3.bf16.msra.mxu1 %v1020_v49 }
 0x3d5   : > { %2816 = vmatprep.subr.msk.bf16.mxu1 %vm556_vm4, %v1092_v53 }
 0x3d7   : > { %2667 = vmatmul.mubr.msk.bf16.vlgmr.msra.gmra.mrb[24].mxu1 %vm617_vm6, %v1007_v54 }
 0x3d8   : > { %2674 = vmatprep.mubr.msk.bf16.mxu1 %vm556_vm4, %v1088_v55 }
 0x3dd   : > { %2671 = vmatpush3.bf16.xpose.msra.mxu1 %v1102_v56 }
 0x3de   : > { %2817 = vmatprep.subr.msk.bf16.mxu1 %vm556_vm4, %v1094_v57 }
 0x3e5   : > { %2673 = vmatpush3.bf16.xpose.msra.mxu1 %v1105_v58 }
 0x3ec   : > { %2675 = vmatmul.mubr.msk.bf16.vlgmr.msra.gmra.mrb[28].mxu1 %vm556_vm4, %v1090_v59 }
 0x479   : > { %v2636_v60 = vpop.f32.mrb[16].mxu1 }
 0x47a   : > { %722 = vst.msk [vmem:[#allocation2 + $0x10] sm:$0x1] %vm721_vm9, %v2636_v60  ;;  %v705_v61 = vpop.f32.mrb[17].mxu1 }
 0x47b   : > { %719 = vst.msk [vmem:[#allocation2] sm:$0xff] %vm556_vm4, %v705_v61  ;;  %v2637_v62 = vpop.f32.mrb[18].mxu1 }
 0x47c   : > { %v708_v63 = vpop.f32.mrb[19].mxu1 }
 0x47d   : > { %720 = vst.msk [vmem:[#allocation2 + $0x8] sm:$0xff] %vm556_vm4, %v708_v63 }
 0x4a2   : > { %v3287_v0 = vpop.f32.mrb[20].mxu1 }
 0x4a3   : > { %v3289_v1 = vpop.f32.mrb[21].mxu1 }
 0x4a4   : > { %v2653_v2 = vpop.f32.mrb[22].mxu1 }
 0x4a5   : > { %v3291_v3 = vpop.f32.mrb[23].mxu1 }
 0x4aa   : > { %v3293_v4 = vpop.f32.mrb[24].mxu1 }
 0x4ab   : > { %v3295_v5 = vpop.f32.mrb[25].mxu1 }
 0x4ac   : > { %v2669_v7 = vpop.f32.mrb[26].mxu1 }
 0x4ad   : > { %v3297_v9 = vpop.f32.mrb[27].mxu1 }
 0x4bf   : > { %v2676_v10 = vpop.f32.mrb[28].mxu1 }
 0x4c0   : > { %v1141_v11 = vpop.f32.mrb[29].mxu1  ;;  %v1161_v15 = vsel %vm624_vm7, %v2676_v10, -inf }
 0x4c1   : > { %v2677_v8 = vpop.f32.mrb[30].mxu1  ;;  %v1155_v12 = vsel %vm617_vm6, %v1141_v11, -inf }
 0x4c2   : > { %1156 = vmax.xlane.f32.xlu0 %v1155_v12  ;;  %v1144_v13 = vpop.f32.mrb[31].mxu1 }
 0x4c3   : > { %v1158_v14 = vsel %vm617_vm6, %v1144_v13, -inf }
 0x4c4   : > { %1159 = vmax.xlane.f32.xlu1 %v1158_v14 }
 0x4c6   : > { %1162 = vmax.xlane.f32.xlu0 %v1161_v15 }
 0x4d5   : > { %1190 = vrot.lane.b32.xlu1 %v3148_v23, %s2987_s29 }
 0x54f   : > { %v1157_v16 = vpop.xlane.xlu0 %1156 }
 0x550   : > { %v1164_v18 = vsub.f32 %v1141_v11, %v1157_v16 }
 0x551   : > { %v1160_v17 = vpop.xlane.xlu1 %1159 }
 0x552   : > { %v1165_v19 = vsub.f32 %v1144_v13, %v1160_v17  ;;  %v1167_v25 = vmul.f32 1.442695, %v1164_v18 }
 0x553   : > { %v1163_v20 = vpop.xlane.xlu0 %1162 }
 0x554   : > { %v1169_v21 = vmul.f32 1.442695, %v1165_v19  ;;  %v1166_v22 = vsub.f32 %v2676_v10, %v1163_v20 }
 0x555   : > { %v1191_v24 = vpop.permute.xlu1 %1190 }
 0x556   : > { %2901 = vpow2.f32 %v1169_v21  ;;  %v1171_v26 = vmul.f32 1.442695, %v1166_v22  ;;  %2678 = vmatprep.subr.bf16.mxu0 %v1191_v24 }
 0x557   : > { %2679 = vmatpush3.bf16.msra.mxu0 %v1191_v24 }
 0x558   : > { %2903 = vpow2.f32 %v1171_v26 }
 0x559   : > { %2905 = vpow2.f32 %v1167_v25 }
 0x560   : > { %v2902_v27 = vpop.eup %2901 }
 0x561   : > { %v1176_v29 = vsel %vm617_vm6, %v2902_v27, 0.0 }
 0x562   : > { %v2904_v30 = vpop.eup %2903  ;;  %1177 = vadd.xlane.f32.xlu1 %v1176_v29 }
 0x563   : > { %v1179_v23 = vsel %vm624_vm7, %v2904_v30, 0.0  ;;  %v2906_v31 = vpop.eup %2905 }
 0x564   : > { %1180 = vadd.xlane.f32.xlu0 %v1179_v23  ;;  %v1173_v32 = vsel %vm617_vm6, %v2906_v31, 0.0 }
 0x568   : > { %1174 = vadd.xlane.f32.xlu0 %v1173_v32 }
 0x573   : > { %1286 = vrot.lane.b32.xlu1 %v3173_v44, %s2976_s10 }
 0x577   : > { %1288 = vrot.lane.b32.xlu1 %v3310_v33, %s2976_s10  ;;  %s2990_s10 = smov 24  }
 0x57e   : > { %1192 = vrot.lane.b32.xlu0 %v3154_v28, %s2987_s29 }
 0x5ef   : > { %v1178_v34 = vpop.xlane.xlu1 %1177 }
 0x5f1   : > { %v1181_v35 = vpop.xlane.xlu0 %1180 }
 0x5f2   : > { %2907 = vrcp.f32 %v1181_v35 }
 0x5f3   : > { %2909 = vrcp.f32 %v1178_v34  ;;  %v1287_v41 = vpop.permute.xlu1 %1286 }
 0x5f4   : > { %v1297_v48 = vsel %vm556_vm4, %v1287_v41, 0 }
 0x5f5   : > { %v1175_v36 = vpop.xlane.xlu0 %1174 }
 0x5f6   : > { %2911 = vrcp.f32 %v1175_v36 }
 0x5f7   : > { %v1289_v49 = vpop.permute.xlu1 %1288 }
 0x5f8   : > { %v1300_v51 = vsel %vm556_vm4, %v1289_v49, 0 }
 0x5f9   : > { %v1193_v37 = vpop.permute.xlu0 %1192 }
 0x5fa   : > { %v1202_v39 = vand.u32 %v1193_v37, %v3226_v50 }
 0x5fc   : > { %2680 = vmatprep.subr.bf16.mxu0 %v1202_v39  ;;  %v2908_v40 = vpop.eup %2907 }
 0x5fd   : > { %2681 = vmatpush3.bf16.msra.mxu0 %v1202_v39  ;;  %v2910_v38 = vpop.eup %2909  ;;  %v1187_v43 = vmul.f32 %v2908_v40, %v2904_v30 }
 0x5fe   : > { %2818 = vmatprep.subr.msk.bf16.mxu0 %vm556_vm4, %v1287_v41  ;;  %v1186_v28 = vmul.f32 %v2910_v38, %v2902_v27 }
 0x5ff   : > { %v1189_v47 = vpack.c.bf16 %v1187_v43, %v1187_v43 }
 0x600   : > { %v2912_v42 = vpop.eup %2911 }
 0x601   : > { %v1185_v45 = vmul.f32 %v2912_v42, %v2906_v31 }
 0x603   : > { %v1188_v46 = vpack.c.bf16 %v1186_v28, %v1185_v45 }
 0x605   : > { %2682 = vmatprep.mubr.msk.bf16.mxu0 %vm617_vm6, %v1188_v46 }
 0x606   : > { %2683 = vmatmul.mubr.msk.bf16.vlgmr.msra.gmra.mrb[8].mxu0 %vm617_vm6, %v1189_v47 }
 0x607   : > { %2687 = vmatpush3.bf16.xpose.msra.mxu0 %v1297_v48  ;;  %2690 = vmatprep.mubr.msk.bf16.mxu0 %vm556_vm4, %v3173_v44 }
 0x608   : > { %2819 = vmatprep.subr.msk.bf16.mxu0 %vm556_vm4, %v1289_v49 }
 0x60f   : > { %2689 = vmatpush3.bf16.xpose.msra.mxu0 %v1300_v51 }
 0x616   : > { %2691 = vmatmul.mubr.msk.bf16.vlgmr.msra.gmra.mrb[12].mxu0 %vm556_vm4, %v3310_v33 }
 0x6d9   : > { %v3327_v52 = vpop.f32.mrb[8].mxu0 }
 0x6da   : > { %v3329_v53 = vpop.f32.mrb[9].mxu0 }
 0x6db   : > { %v2685_v54 = vpop.f32.mrb[10].mxu0 }
 0x6dc   : > { %v3331_v55 = vpop.f32.mrb[11].mxu0 }
 0x6e9   : > { %v2692_v56 = vpop.f32.mrb[12].mxu0 }
 0x6ea   : > { %v1336_v57 = vpop.f32.mrb[13].mxu0  ;;  %v1356_v62 = vsel %vm624_vm7, %v2692_v56, -inf }
 0x6eb   : > { %v2693_v58 = vpop.f32.mrb[14].mxu0  ;;  %v1350_v59 = vsel %vm617_vm6, %v1336_v57, -inf }
 0x6ec   : > { %1351 = vmax.xlane.f32.xlu0 %v1350_v59  ;;  %v1339_v60 = vpop.f32.mrb[15].mxu0 }
 0x6ed   : > { %v1353_v61 = vsel %vm617_vm6, %v1339_v60, -inf }
 0x6ee   : > { %1354 = vmax.xlane.f32.xlu1 %v1353_v61 }
 0x6f0   : > { %1357 = vmax.xlane.f32.xlu0 %v1356_v62 }
 0x6ff   : > { %1385 = vrot.lane.b32.xlu1 %v3173_v44, %s2981_s18 }
 0x779   : > { %v1352_v63 = vpop.xlane.xlu0 %1351 }
 0x77a   : > { %v1359_v7 = vsub.f32 %v1336_v57, %v1352_v63 }
 0x77b   : > { %v1355_v2 = vpop.xlane.xlu1 %1354 }
 0x77c   : > { %v1360_v10 = vsub.f32 %v1339_v60, %v1355_v2  ;;  %v1362_v14 = vmul.f32 1.442695, %v1359_v7 }
 0x77d   : > { %v1358_v11 = vpop.xlane.xlu0 %1357 }
 0x77e   : > { %v1364_v8 = vmul.f32 1.442695, %v1360_v10  ;;  %v1361_v12 = vsub.f32 %v2692_v56, %v1358_v11 }
 0x77f   : > { %v1386_v13 = vpop.permute.xlu1 %1385 }
 0x780   : > { %2913 = vpow2.f32 %v1364_v8  ;;  %v1366_v15 = vmul.f32 1.442695, %v1361_v12  ;;  %2694 = vmatprep.subr.bf16.mxu1 %v1386_v13 }
 0x781   : > { %2695 = vmatpush3.bf16.msra.mxu1 %v1386_v13 }
 0x782   : > { %2915 = vpow2.f32 %v1366_v15 }
 0x783   : > { %2917 = vpow2.f32 %v1362_v14 }
 0x78a   : > { %v2914_v16 = vpop.eup %2913 }
 0x78b   : > { %v1371_v17 = vsel %vm617_vm6, %v2914_v16, 0.0 }
 0x78c   : > { %v2916_v18 = vpop.eup %2915  ;;  %1372 = vadd.xlane.f32.xlu1 %v1371_v17 }
 0x78d   : > { %v1374_v19 = vsel %vm624_vm7, %v2916_v18, 0.0  ;;  %v2918_v20 = vpop.eup %2917 }
 0x78e   : > { %1375 = vadd.xlane.f32.xlu0 %v1374_v19  ;;  %v1368_v21 = vsel %vm617_vm6, %v2918_v20, 0.0 }
 0x792   : > { %1369 = vadd.xlane.f32.xlu0 %v1368_v21 }
 0x79d   : > { %1454 = vrot.lane.b32.xlu1 %v3173_v44, %s2977_s15 }
 0x7a1   : > { %1456 = vrot.lane.b32.xlu1 %v3310_v33, %s2977_s15 }
 0x7a5   : > { %1452 = vrot.lane.b32.xlu1 %v3310_v33, %s2978_s17 }
 0x7a8   : > { %1387 = vrot.lane.b32.xlu0 %v3310_v33, %s2981_s18 }
 0x7ac   : > { %1450 = vrot.lane.b32.xlu0 %v3173_v44, %s2978_s17 }
 0x819   : > { %v1373_v22 = vpop.xlane.xlu1 %1372 }
 0x81b   : > { %v1376_v24 = vpop.xlane.xlu0 %1375 }
 0x81c   : > { %2919 = vrcp.f32 %v1376_v24 }
 0x81d   : > { %2921 = vrcp.f32 %v1373_v22  ;;  %v1455_v30 = vpop.permute.xlu1 %1454 }
 0x81e   : > { %v1465_v39 = vsel %vm556_vm4, %v1455_v30, 0 }
 0x81f   : > { %v1370_v25 = vpop.xlane.xlu0 %1369 }
 0x820   : > { %2923 = vrcp.f32 %v1370_v25 }
 0x821   : > { %v1457_v41 = vpop.permute.xlu1 %1456 }
 0x822   : > { %v1468_v38 = vsel %vm556_vm4, %v1457_v41, 0 }
 0x823   : > { %v1388_v26 = vpop.permute.xlu0 %1387 }
 0x824   : > { %v1397_v27 = vand.u32 %v1388_v26, %v3226_v50 }
 0x825   : > { %v1453_v42 = vpop.permute.xlu1 %1452 }
 0x826   : > { %2696 = vmatprep.subr.bf16.mxu1 %v1397_v27  ;;  %v2920_v29 = vpop.eup %2919 }
 0x827   : > { %2697 = vmatpush3.bf16.msra.mxu1 %v1397_v27  ;;  %v2922_v23 = vpop.eup %2921  ;;  %v1382_v32 = vmul.f32 %v2920_v29, %v2916_v18  ;;  %v1451_v40 = vpop.permute.xlu0 %1450 }
 0x828   : > { %2820 = vmatprep.subr.msk.bf16.mxu1 %vm556_vm4, %v1455_v30  ;;  %v1381_v35 = vmul.f32 %v2922_v23, %v2914_v16 }
 0x829   : > { %v1384_v37 = vpack.c.bf16 %v1382_v32, %v1382_v32 }
 0x82a   : > { %v2924_v31 = vpop.eup %2923 }
 0x82b   : > { %v1380_v34 = vmul.f32 %v2924_v31, %v2918_v20 }
 0x82d   : > { %v1383_v36 = vpack.c.bf16 %v1381_v35, %v1380_v34 }
 0x82f   : > { %2698 = vmatprep.mubr.msk.bf16.mxu1 %vm617_vm6, %v1383_v36 }
 0x830   : > { %2699 = vmatmul.mubr.msk.bf16.vlgmr.msra.gmra.mrb[32].mxu1 %vm617_vm6, %v1384_v37 }
 0x831   : > { %2703 = vmatpush3.bf16.xpose.msra.mxu1 %v1465_v39  ;;  %2706 = vmatprep.mubr.msk.bf16.mxu1 %vm556_vm4, %v1451_v40 }
 0x832   : > { %2821 = vmatprep.subr.msk.bf16.mxu1 %vm556_vm4, %v1457_v41 }
 0x839   : > { %2705 = vmatpush3.bf16.xpose.msra.mxu1 %v1468_v38 }
 0x840   : > { %2707 = vmatmul.mubr.msk.bf16.vlgmr.msra.gmra.mrb[36].mxu1 %vm556_vm4, %v1453_v42 }
 0x903   : > { %v2700_v43 = vpop.f32.mrb[32].mxu1 }
 0x904   : > { %1449 = vst.msk [vmem:[#allocation2 + $0x21] sm:$0x1] %vm721_vm9, %v2700_v43  ;;  %v1433_v45 = vpop.f32.mrb[33].mxu1 }
 0x905   : > { %1447 = vst.msk [vmem:[#allocation2 + $0x11] sm:$0xff] %vm556_vm4, %v1433_v45  ;;  %v2701_v28 = vpop.f32.mrb[34].mxu1 }
 0x906   : > { %v1436_v46 = vpop.f32.mrb[35].mxu1 }
 0x907   : > { %1448 = vst.msk [vmem:[#allocation2 + $0x19] sm:$0xff] %vm556_vm4, %v1436_v46 }
 0x913   : > { %v2708_v47 = vpop.f32.mrb[36].mxu1 }
 0x914   : > { %v1504_v48 = vpop.f32.mrb[37].mxu1  ;;  %v1524_v57 = vsel %vm624_vm7, %v2708_v47, -inf }
 0x915   : > { %v2709_v49 = vpop.f32.mrb[38].mxu1  ;;  %v1518_v51 = vsel %vm617_vm6, %v1504_v48, -inf }
 0x916   : > { %1519 = vmax.xlane.f32.xlu0 %v1518_v51  ;;  %v1507_v54 = vpop.f32.mrb[39].mxu1 }
 0x917   : > { %v1521_v56 = vsel %vm617_vm6, %v1507_v54, -inf }
 0x918   : > { %1522 = vmax.xlane.f32.xlu1 %v1521_v56 }
 0x91a   : > { %1525 = vmax.xlane.f32.xlu0 %v1524_v57 }
 0x929   : > { %1553 = vrot.lane.b32.xlu1 %v3173_v44, %s2982_s25 }
 0x9a3   : > { %v1520_v58 = vpop.xlane.xlu0 %1519 }
 0x9a4   : > { %v1527_v60 = vsub.f32 %v1504_v48, %v1520_v58 }
 0x9a5   : > { %v1523_v59 = vpop.xlane.xlu1 %1522 }
 0x9a6   : > { %v1528_v61 = vsub.f32 %v1507_v54, %v1523_v59  ;;  %v1530_v10 = vmul.f32 1.442695, %v1527_v60 }
 0x9a7   : > { %v1526_v62 = vpop.xlane.xlu0 %1525 }
 0x9a8   : > { %v1532_v63 = vmul.f32 1.442695, %v1528_v61  ;;  %v1529_v2 = vsub.f32 %v2708_v47, %v1526_v62 }
 0x9a9   : > { %v1554_v7 = vpop.permute.xlu1 %1553 }
 0x9aa   : > { %2925 = vpow2.f32 %v1532_v63  ;;  %v1534_v11 = vmul.f32 1.442695, %v1529_v2  ;;  %2710 = vmatprep.subr.bf16.mxu0 %v1554_v7 }
 0x9ab   : > { %2711 = vmatpush3.bf16.msra.mxu0 %v1554_v7 }
 0x9ac   : > { %2927 = vpow2.f32 %v1534_v11 }
 0x9ad   : > { %2929 = vpow2.f32 %v1530_v10 }
 0x9b4   : > { %v2926_v8 = vpop.eup %2925 }
 0x9b5   : > { %v1539_v12 = vsel %vm617_vm6, %v2926_v8, 0.0 }
 0x9b6   : > { %v2928_v13 = vpop.eup %2927  ;;  %1540 = vadd.xlane.f32.xlu1 %v1539_v12 }
 0x9b7   : > { %v1542_v14 = vsel %vm624_vm7, %v2928_v13, 0.0  ;;  %v2930_v15 = vpop.eup %2929 }
 0x9b8   : > { %1543 = vadd.xlane.f32.xlu0 %v1542_v14  ;;  %v1536_v16 = vsel %vm617_vm6, %v2930_v15, 0.0 }
 0x9bc   : > { %1537 = vadd.xlane.f32.xlu0 %v1536_v16 }
 0x9c7   : > { %1634 = vrot.lane.b32.xlu1 %v3173_v44, %s2979_s20 }
 0x9cb   : > { %1636 = vrot.lane.b32.xlu1 %v3310_v33, %s2979_s20 }
 0x9cf   : > { %1632 = vrot.lane.b32.xlu1 %v3310_v33, %s2980_s23 }
 0x9d2   : > { %1555 = vrot.lane.b32.xlu0 %v3310_v33, %s2982_s25 }
 0x9d6   : > { %1630 = vrot.lane.b32.xlu0 %v3173_v44, %s2980_s23 }
 0xa43   : > { %v1541_v17 = vpop.xlane.xlu1 %1540 }
 0xa45   : > { %v1544_v18 = vpop.xlane.xlu0 %1543 }
 0xa46   : > { %2931 = vrcp.f32 %v1544_v18 }
 0xa47   : > { %2933 = vrcp.f32 %v1541_v17  ;;  %v1635_v24 = vpop.permute.xlu1 %1634 }
 0xa48   : > { %v1645_v32 = vsel %vm556_vm4, %v1635_v24, 0 }
 0xa49   : > { %v1538_v19 = vpop.xlane.xlu0 %1537 }
 0xa4a   : > { %2935 = vrcp.f32 %v1538_v19 }
 0xa4b   : > { %v1637_v35 = vpop.permute.xlu1 %1636 }
 0xa4c   : > { %v1648_v36 = vsel %vm556_vm4, %v1637_v35, 0 }
 0xa4d   : > { %v1556_v20 = vpop.permute.xlu0 %1555 }
 0xa4e   : > { %v1565_v21 = vand.u32 %v1556_v20, %v3226_v50 }
 0xa4f   : > { %v1633_v37 = vpop.permute.xlu1 %1632 }
 0xa50   : > { %2712 = vmatprep.subr.bf16.mxu0 %v1565_v21  ;;  %v2932_v22 = vpop.eup %2931 }
 0xa51   : > { %2713 = vmatpush3.bf16.msra.mxu0 %v1565_v21  ;;  %v2934_v25 = vpop.eup %2933  ;;  %v1550_v27 = vmul.f32 %v2932_v22, %v2928_v13  ;;  %v1631_v34 = vpop.permute.xlu0 %1630 }
 0xa52   : > { %2822 = vmatprep.subr.msk.bf16.mxu0 %vm556_vm4, %v1635_v24  ;;  %v1549_v30 = vmul.f32 %v2934_v25, %v2926_v8 }
 0xa53   : > { %v1552_v31 = vpack.c.bf16 %v1550_v27, %v1550_v27 }
 0xa54   : > { %v2936_v26 = vpop.eup %2935 }
 0xa55   : > { %v1548_v29 = vmul.f32 %v2936_v26, %v2930_v15 }
 0xa57   : > { %v1551_v23 = vpack.c.bf16 %v1549_v30, %v1548_v29 }
 0xa59   : > { %2714 = vmatprep.mubr.msk.bf16.mxu0 %vm617_vm6, %v1551_v23 }
 0xa5a   : > { %2715 = vmatmul.mubr.msk.bf16.vlgmr.msra.gmra.mrb[16].mxu0 %vm617_vm6, %v1552_v31 }
 0xa5b   : > { %2719 = vmatpush3.bf16.xpose.msra.mxu0 %v1645_v32  ;;  %2722 = vmatprep.mubr.msk.bf16.mxu0 %vm556_vm4, %v1631_v34 }
 0xa5c   : > { %2823 = vmatprep.subr.msk.bf16.mxu0 %vm556_vm4, %v1637_v35 }
 0xa63   : > { %2721 = vmatpush3.bf16.xpose.msra.mxu0 %v1648_v36 }
 0xa6a   : > { %2723 = vmatmul.mubr.msk.bf16.vlgmr.msra.gmra.mrb[20].mxu0 %vm556_vm4, %v1633_v37 }
 0xb2d   : > { %v3390_v39 = vpop.f32.mrb[16].mxu0 }
 0xb2e   : > { %v3392_v40 = vpop.f32.mrb[17].mxu0 }
 0xb2f   : > { %v2717_v41 = vpop.f32.mrb[18].mxu0 }
 0xb30   : > { %v3394_v38 = vpop.f32.mrb[19].mxu0 }
 0xb3d   : > { %v2724_v42 = vpop.f32.mrb[20].mxu0 }
 0xb3e   : > { %v1684_v43 = vpop.f32.mrb[21].mxu0  ;;  %v1704_v48 = vsel %vm624_vm7, %v2724_v42, -inf }
 0xb3f   : > { %v2725_v45 = vpop.f32.mrb[22].mxu0  ;;  %v1698_v28 = vsel %vm617_vm6, %v1684_v43, -inf }
 0xb40   : > { %1699 = vmax.xlane.f32.xlu0 %v1698_v28  ;;  %v1687_v46 = vpop.f32.mrb[23].mxu0 }
 0xb41   : > { %v1701_v47 = vsel %vm617_vm6, %v1687_v46, -inf }
 0xb42   : > { %1702 = vmax.xlane.f32.xlu1 %v1701_v47 }
 0xb44   : > { %1705 = vmax.xlane.f32.xlu0 %v1704_v48 }
 0xb53   : > { %1733 = vrot.lane.b32.xlu1 %v3173_v44, %s2984_s12 }
 0xbcd   : > { %v1700_v49 = vpop.xlane.xlu0 %1699 }
 0xbce   : > { %v1707_v54 = vsub.f32 %v1684_v43, %v1700_v49 }
 0xbcf   : > { %v1703_v51 = vpop.xlane.xlu1 %1702 }
 0xbd0   : > { %v1708_v56 = vsub.f32 %v1687_v46, %v1703_v51  ;;  %v1710_v61 = vmul.f32 1.442695, %v1707_v54 }
 0xbd1   : > { %v1706_v57 = vpop.xlane.xlu0 %1705 }
 0xbd2   : > { %v1712_v58 = vmul.f32 1.442695, %v1708_v56  ;;  %v1709_v59 = vsub.f32 %v2724_v42, %v1706_v57 }
 0xbd3   : > { %v1734_v60 = vpop.permute.xlu1 %1733 }
 0xbd4   : > { %2937 = vpow2.f32 %v1712_v58  ;;  %v1714_v62 = vmul.f32 1.442695, %v1709_v59  ;;  %2726 = vmatprep.subr.bf16.mxu1 %v1734_v60 }
 0xbd5   : > { %2727 = vmatpush3.bf16.msra.mxu1 %v1734_v60 }
 0xbd6   : > { %2939 = vpow2.f32 %v1714_v62 }
 0xbd7   : > { %2941 = vpow2.f32 %v1710_v61 }
 0xbde   : > { %v2938_v63 = vpop.eup %2937 }
 0xbdf   : > { %v1719_v2 = vsel %vm617_vm6, %v2938_v63, 0.0 }
 0xbe0   : > { %v2940_v7 = vpop.eup %2939  ;;  %1720 = vadd.xlane.f32.xlu1 %v1719_v2 }
 0xbe1   : > { %v1722_v10 = vsel %vm624_vm7, %v2940_v7, 0.0  ;;  %v2942_v11 = vpop.eup %2941 }
 0xbe2   : > { %1723 = vadd.xlane.f32.xlu0 %v1722_v10  ;;  %v1716_v8 = vsel %vm617_vm6, %v2942_v11, 0.0 }
 0xbe6   : > { %1717 = vadd.xlane.f32.xlu0 %v1716_v8 }
 0xbf1   : > { %1814 = vrot.lane.b32.xlu1 %v3173_v44, %s2985_s26 }
 0xbf5   : > { %1816 = vrot.lane.b32.xlu1 %v3310_v33, %s2985_s26 }
 0xbf9   : > { %1812 = vrot.lane.b32.xlu1 %v3310_v33, %s2986_s28 }
 0xbfc   : > { %1735 = vrot.lane.b32.xlu0 %v3310_v33, %s2984_s12 }
 0xc00   : > { %1810 = vrot.lane.b32.xlu0 %v3173_v44, %s2986_s28 }
 0xc6d   : > { %v1721_v12 = vpop.xlane.xlu1 %1720 }
 0xc6f   : > { %v1724_v13 = vpop.xlane.xlu0 %1723 }
 0xc70   : > { %2943 = vrcp.f32 %v1724_v13 }
 0xc71   : > { %2945 = vrcp.f32 %v1721_v12  ;;  %v1815_v18 = vpop.permute.xlu1 %1814 }
 0xc72   : > { %v1825_v27 = vsel %vm556_vm4, %v1815_v18, 0 }
 0xc73   : > { %v1718_v14 = vpop.xlane.xlu0 %1717 }
 0xc74   : > { %2947 = vrcp.f32 %v1718_v14  ;;  %v2853_v14 = vld [vmem:[%s3062_s21] sm:$0xff]  }
 0xc75   : > { %v1817_v30 = vpop.permute.xlu1 %1816 }
 0xc76   : > { %v1828_v23 = vsel %vm556_vm4, %v1817_v30, 0 }
 0xc77   : > { %v1736_v15 = vpop.permute.xlu0 %1735 }
 0xc78   : > { %v1745_v16 = vand.u32 %v1736_v15, %v3226_v50 }
 0xc79   : > { %v1813_v31 = vpop.permute.xlu1 %1812 }
 0xc7a   : > { %2728 = vmatprep.subr.bf16.mxu1 %v1745_v16  ;;  %v2944_v17 = vpop.eup %2943 }
 0xc7b   : > { %2729 = vmatpush3.bf16.msra.mxu1 %v1745_v16  ;;  %v2946_v19 = vpop.eup %2945  ;;  %v1730_v21 = vmul.f32 %v2944_v17, %v2940_v7  ;;  %v1811_v29 = vpop.permute.xlu0 %1810 }
 0xc7c   : > { %2824 = vmatprep.subr.msk.bf16.mxu1 %vm556_vm4, %v1815_v18  ;;  %v1729_v24 = vmul.f32 %v2946_v19, %v2938_v63  ;;  %v2854_v18 = vld [vmem:[%s3062_s21 + $0x8] sm:$0xff]  }
 0xc7d   : > { %v1732_v26 = vpack.c.bf16 %v1730_v21, %v1730_v21 }
 0xc7e   : > { %v2948_v20 = vpop.eup %2947 }
 0xc7f   : > { %v1728_v22 = vmul.f32 %v2948_v20, %v2942_v11 }
 0xc81   : > { %v1731_v25 = vpack.c.bf16 %v1729_v24, %v1728_v22 }
 0xc83   : > { %2730 = vmatprep.mubr.msk.bf16.mxu1 %vm617_vm6, %v1731_v25 }
 0xc84   : > { %2731 = vmatmul.mubr.msk.bf16.vlgmr.msra.gmra.mrb[40].mxu1 %vm617_vm6, %v1732_v26 }
 0xc85   : > { %2735 = vmatpush3.bf16.xpose.msra.mxu1 %v1825_v27  ;;  %2738 = vmatprep.mubr.msk.bf16.mxu1 %vm556_vm4, %v1811_v29  ;;  %v2855_v29 = vld [vmem:[%s3071_s27] sm:$0xff]  }
 0xc86   : > { %2825 = vmatprep.subr.msk.bf16.mxu1 %vm556_vm4, %v1817_v30  ;;  %v2856_v30 = vld [vmem:[%s3071_s27 + $0x8] sm:$0xff]  }
 0xc8d   : > { %2737 = vmatpush3.bf16.xpose.msra.mxu1 %v1828_v23 }
 0xc8e   : > { %2766 = vmatprep.subr.bf16.mxu1 %v2974_v6 }
 0xc94   : > { %2739 = vmatmul.mubr.msk.bf16.vlgmr.msra.gmra.mrb[44].mxu1 %vm556_vm4, %v1813_v31 }
 0xc95   : > { %2770 = vmatprep.mubr.msk.bf16.mxu1 %vm2975_vm2, %v2974_v6  ;;  %2767 = vmatpush3.bf16.msra.mxu1 %v2855_v29 }
 0xc96   : > { %2768 = vmatprep.subr.bf16.mxu1 %v2974_v6 }
 0xc99   : > { %2769 = vmatpush3.bf16.msra.mxu1 %v2856_v30 }
 0xd57   : > { %v3426_v32 = vpop.f32.mrb[40].mxu1 }
 0xd58   : > { %v1781_v34 = vpop.f32.mrb[41].mxu1 }
 0xd59   : > { %v2733_v35 = vpop.f32.mrb[42].mxu1 }
 0xd5a   : > { %v1784_v36 = vpop.f32.mrb[43].mxu1 }
 0xd67   : > { %v2740_v37 = vpop.f32.mrb[44].mxu1 }
 0xd68   : > { %v1864_v41 = vpop.f32.mrb[45].mxu1  ;;  %v1884_v46 = vsel %vm624_vm7, %v2740_v37, -inf }
 0xd69   : > { %v2741_v42 = vpop.f32.mrb[46].mxu1  ;;  %v1878_v43 = vsel %vm617_vm6, %v1864_v41, -inf }
 0xd6a   : > { %1879 = vmax.xlane.f32.xlu0 %v1878_v43  ;;  %v1867_v45 = vpop.f32.mrb[47].mxu1  ;;  %v2857_v43 = vld [vmem:[%s3081_s19] sm:$0xff]  }
 0xd6b   : > { %v1881_v28 = vsel %vm617_vm6, %v1867_v45, -inf }
 0xd6c   : > { %1882 = vmax.xlane.f32.xlu1 %v1881_v28 }
 0xd6e   : > { %1885 = vmax.xlane.f32.xlu0 %v1884_v46 }
 0xdf7   : > { %v1880_v47 = vpop.xlane.xlu0 %1879 }
 0xdf8   : > { %v1887_v49 = vsub.f32 %v1864_v41, %v1880_v47  ;;  %v2858_v47 = vld [vmem:[%s3081_s19 + $0x8] sm:$0xff]  }
 0xdf9   : > { %v1883_v48 = vpop.xlane.xlu1 %1882 }
 0xdfa   : > { %v1888_v51 = vsub.f32 %v1867_v45, %v1883_v48  ;;  %v1890_v58 = vmul.f32 1.442695, %v1887_v49  ;;  %v3506_v45 = vld [vmem:[%s417_s24] ss:$0 sm:$0xff] }
 0xdfb   : > { %v1886_v54 = vpop.xlane.xlu0 %1885 }
 0xdfc   : > { %v1892_v56 = vmul.f32 1.442695, %v1888_v51  ;;  %v1889_v57 = vsub.f32 %v2740_v37, %v1886_v54  ;;  %v2961_v37 = vld [vmem:[%s3611_s9] sm:$0xff]  ;;  %v2859_v54 = vld [vmem:[%s3081_s19 + $0x10] sm:$0xff]  }
 0xdfe   : > { %2949 = vpow2.f32 %v1892_v56  ;;  %v1894_v59 = vmul.f32 1.442695, %v1889_v57  ;;  %v2860_v56 = vld [vmem:[%s3081_s19 + $0x18] sm:$0xff]   ;;  %v2861_v57 = vld [vmem:[%s3081_s19 + $0x20] sm:$0xff]  }
 0xe00   : > { %2951 = vpow2.f32 %v1894_v59  ;;  %v2863_v59 = vld [vmem:[%s3081_s19 + $0x30] sm:$0xff]  }
 0xe01   : > { %2953 = vpow2.f32 %v1890_v58  ;;  %v2862_v58 = vld [vmem:[%s3081_s19 + $0x28] sm:$0xff]  }
 0xe08   : > { %v2950_v60 = vpop.eup %2949 }
 0xe09   : > { %v1899_v61 = vsel %vm617_vm6, %v2950_v60, 0.0 }
 0xe0a   : > { %v2952_v62 = vpop.eup %2951  ;;  %1900 = vadd.xlane.f32.xlu1 %v1899_v61 }
 0xe0b   : > { %v1902_v63 = vsel %vm624_vm7, %v2952_v62, 0.0  ;;  %v2954_v2 = vpop.eup %2953 }
 0xe0c   : > { %1903 = vadd.xlane.f32.xlu0 %v1902_v63  ;;  %v1896_v7 = vsel %vm617_vm6, %v2954_v2, 0.0 }
 0xe10   : > { %1897 = vadd.xlane.f32.xlu0 %v1896_v7 }
 0xe1b   : > { %1913 = vrot.lane.b32.xlu1 %v3173_v44, %s2987_s29 }
 0xe1f   : > { %891 = vrot.lane.b32.xlu1 %v3289_v1, %s2988_s14 }
 0xe23   : > { %893 = vrot.lane.b32.xlu1 %v3291_v3, %s2988_s14 }
 0xe26   : > { %1915 = vrot.lane.b32.xlu0 %v3310_v33, %s2987_s29 }
 0xe27   : > { %1075 = vrot.lane.b32.xlu1 %v3297_v9, %s2989_s16 }
 0xe2a   : > { %1073 = vrot.lane.b32.xlu0 %v3295_v5, %s2989_s16 }
 0xe2b   : > { %1257 = vrot.lane.b32.xlu1 %v3331_v55, %s2990_s10 }
 0xe2e   : > { %1255 = vrot.lane.b32.xlu0 %v3329_v53, %s2990_s10 }
 0xe2f   : > { %1618 = vrot.lane.b32.xlu1 %v3392_v40, %s2988_s14 }
 0xe32   : > { %895 = vrot.lane.b32.xlu0 %v3287_v0, %s2988_s14 }
 0xe33   : > { %1077 = vrot.lane.b32.xlu1 %v3293_v4, %s2989_s16 }
 0xe36   : > { %1620 = vrot.lane.b32.xlu0 %v3394_v38, %s2988_s14 }
 0xe37   : > { %1800 = vrot.lane.b32.xlu1 %v1784_v36, %s2989_s16 }
 0xe3a   : > { %1798 = vrot.lane.b32.xlu0 %v1781_v34, %s2989_s16 }
 0xe3e   : > { %1259 = vrot.lane.b32.xlu0 %v3327_v52, %s2990_s10 }
 0xe97   : > { %v1901_v44 = vpop.xlane.xlu1 %1900 }
 0xe99   : > { %v1904_v1 = vpop.xlane.xlu0 %1903 }
 0xe9a   : > { %2955 = vrcp.f32 %v1904_v1 }
 0xe9b   : > { %v1914_v3 = vpop.permute.xlu1 %1913  ;;  %2957 = vrcp.f32 %v1901_v44 }
 0xe9c   : > { %2742 = vmatprep.subr.bf16.mxu0 %v1914_v3 }
 0xe9d   : > { %v1898_v0 = vpop.xlane.xlu0 %1897  ;;  %2743 = vmatpush3.bf16.msra.mxu0 %v1914_v3 }
 0xe9e   : > { %2959 = vrcp.f32 %v1898_v0 }
 0xe9f   : > { %v892_v4 = vpop.permute.xlu1 %891 }
 0xea0   : > { %901 = vst.msk [vmem:[#allocation2] sm:$0xff] %vm900_vm10, %v892_v4 }
 0xea1   : > { %v1916_v5 = vpop.permute.xlu0 %1915 }
 0xea2   : > { %v1925_v9 = vand.u32 %v1916_v5, %v3226_v50  ;;  %v2495_v5 = vld [vmem:[%s425_s13] ss:$0 sm:$0xff] }
 0xea3   : > { %v894_v33 = vpop.permute.xlu1 %893 }
 0xea4   : > { %902 = vst.msk [vmem:[#allocation2 + $0x8] sm:$0xff] %vm900_vm10, %v894_v33  ;;  %2744 = vmatprep.subr.bf16.mxu0 %v1925_v9  ;;  %v2956_v52 = vpop.eup %2955 }
 0xea5   : > { %v1074_v53 = vpop.permute.xlu0 %1073  ;;  %2745 = vmatpush3.bf16.msra.mxu0 %v1925_v9  ;;  %v2958_v55 = vpop.eup %2957  ;;  %v1910_v10 = vmul.f32 %v2956_v52, %v2952_v62 }
 0xea6   : > { %1083 = vst.msk [vmem:[#allocation2] sm:$0xff] %vm1082_vm11, %v1074_v53  ;;  %2750 = vmatprep.subr.bf16.mxu0 %v2974_v6  ;;  %v1909_v8 = vmul.f32 %v2958_v55, %v2950_v60  ;;  %v2864_v60 = vld [vmem:[%s3081_s19 + $0x38] sm:$0xff]  }
 0xea7   : > { %v1076_v40 = vpop.permute.xlu1 %1075  ;;  %v1912_v15 = vpack.c.bf16 %v1910_v10, %v1910_v10 }
 0xea8   : > { %v2960_v38 = vpop.eup %2959  ;;  %1084 = vst.msk [vmem:[#allocation2 + $0x8] sm:$0xff] %vm1082_vm11, %v1076_v40 }
 0xea9   : > { %v1256_v50 = vpop.permute.xlu0 %1255  ;;  %v1908_v11 = vmul.f32 %v2960_v38, %v2954_v2 }
 0xeaa   : > { %1265 = vst.msk [vmem:[#allocation2] sm:$0xff] %vm1264_vm12, %v1256_v50 }
 0xeab   : > { %v1258_v12 = vpop.permute.xlu1 %1257  ;;  %v1911_v13 = vpack.c.bf16 %v1909_v8, %v1908_v11  ;;  %v2963_v8 = vld [vmem:[%s3611_s9 + $0x10] sm:$0xff] }
 0xeac   : > { %1266 = vst.msk [vmem:[#allocation2 + $0x8] sm:$0xff] %vm1264_vm12, %v1258_v12 }
 0xead   : > { %v896_v16 = vpop.permute.xlu0 %895  ;;  %2746 = vmatprep.mubr.msk.bf16.mxu0 %vm617_vm6, %v1911_v13 }
 0xeae   : > { %904 = vst.msk [vmem:[#allocation2 + $0x10] sm:$0x1] %vm903_vm13, %v896_v16  ;;  %2747 = vmatmul.mubr.msk.bf16.vlgmr.msra.gmra.mrb[24].mxu0 %vm617_vm6, %v1912_v15  ;;  %v2964_v15 = vld [vmem:[%s3611_s9 + $0x18] sm:$0xff] }
 0xeaf   : > { %2751 = vmatpush3.bf16.msra.mxu0 %v2853_v14  ;;  %v1619_v17 = vpop.permute.xlu1 %1618  ;;  %2754 = vmatprep.mubr.msk.bf16.mxu0 %vm2975_vm2, %v2974_v6 }
 0xeb0   : > { %1627 = vst.msk [vmem:[#allocation2 + $0x11] sm:$0xff] %vm900_vm10, %v1619_v17  ;;  %2752 = vmatprep.subr.bf16.mxu0 %v2974_v6 }
 0xeb1   : > { %v1621_v19 = vpop.permute.xlu0 %1620  ;;  %v1990_v21 = vld [vmem:[#allocation2] sm:$0xff] }
 0xeb2   : > { %1628 = vst.msk [vmem:[#allocation2 + $0x19] sm:$0xff] %vm900_vm10, %v1621_v19 }
 0xeb3   : > { %2753 = vmatpush3.bf16.msra.mxu0 %v2854_v18  ;;  %v1078_v20 = vpop.permute.xlu1 %1077  ;;  %v1991_v22 = vld [vmem:[#allocation2 + $0x8] sm:$0xff] }
 0xeb4   : > { %1086 = vst.msk [vmem:[#allocation2 + $0x10] sm:$0x1] %vm1085_vm14, %v1078_v20  ;;  %v1995_v24 = vpack.c.bf16 %v1991_v22, %v1990_v21  ;;  %2782 = vmatprep.subr.bf16.mxu0 %v2974_v6  ;;  %v2965_v22 = vld [vmem:[%s3611_s9 + $0x20] sm:$0x3] }
 0xeb5   : > { %v1799_v25 = vpop.permute.xlu0 %1798 }
 0xeb6   : > { %1807 = vst.msk [vmem:[#allocation2 + $0x11] sm:$0xff] %vm1082_vm11, %v1799_v25  ;;  %2755 = vmatmul.mubr.msk.bf16.vlgmr.msra.gmra.mrb[28].mxu0 %vm482_vm3, %v1995_v24 }
 0xeb7   : > { %v1801_v26 = vpop.permute.xlu1 %1800  ;;  %2758 = vmatprep.mubr.msk.bf16.mxu0 %vm2975_vm2, %v2974_v6  ;;  %2783 = vmatpush3.bf16.msra.mxu0 %v2857_v43 }
 0xeb8   : > { %1808 = vst.msk [vmem:[#allocation2 + $0x19] sm:$0xff] %vm1082_vm11, %v1801_v26  ;;  %2784 = vmatprep.subr.bf16.mxu0 %v2974_v6 }
 0xeb9   : > { %v1260_v27 = vpop.permute.xlu0 %1259 }
 0xeba   : > { %1268 = vst.msk [vmem:[#allocation2 + $0x10] sm:$0x1] %vm1267_vm15, %v1260_v27 }
 0xebb   : > { %2785 = vmatpush3.bf16.msra.mxu0 %v2858_v47 }
 0xebc   : > { %2786 = vmatprep.subr.bf16.mxu0 %v2974_v6 }
 0xebf   : > { %2787 = vmatpush3.bf16.msra.mxu0 %v2859_v54 }
 0xec0   : > { %2788 = vmatprep.subr.bf16.mxu0 %v2974_v6 }
 0xec3   : > { %2789 = vmatpush3.bf16.msra.mxu0 %v2860_v56 }
 0xec4   : > { %2790 = vmatprep.subr.bf16.mxu0 %v2974_v6 }
 0xec7   : > { %2791 = vmatpush3.bf16.msra.mxu0 %v2861_v57 }
 0xec8   : > { %2792 = vmatprep.subr.bf16.mxu0 %v2974_v6 }
 0xecb   : > { %2793 = vmatpush3.bf16.msra.mxu0 %v2862_v58 }
 0xecc   : > { %2794 = vmatprep.subr.bf16.mxu0 %v2974_v6 }
 0xecf   : > { %2795 = vmatpush3.bf16.msra.mxu0 %v2863_v59 }
 0xed0   : > { %2796 = vmatprep.subr.bf16.mxu0 %v2974_v6 }
 0xed3   : > { %2797 = vmatpush3.bf16.msra.mxu0 %v2864_v60 }
 0xf81   : > { %v2748_v23 = vpop.f32.mrb[24].mxu0 }
 0xf82   : > { %v1961_v31 = vpop.f32.mrb[25].mxu0 }
 0xf83   : > { %1978 = vrot.lane.b32.xlu1 %v1961_v31, %s2990_s10  ;;  %v2749_v34 = vpop.f32.mrb[26].mxu0  ;;  %v2509_v31 = vld [vmem:[%s433_s22] ss:$0 sm:$0xff] }
 0xf84   : > { %v1964_v35 = vpop.f32.mrb[27].mxu0 }
 0xf85   : > { %1980 = vrot.lane.b32.xlu0 %v1964_v35, %s2990_s10 }
 0xf87   : > { %1622 = vrot.lane.b32.xlu1 %v3390_v39, %s2988_s14 }
 0xf89   : > { %1802 = vrot.lane.b32.xlu0 %v3426_v32, %s2989_s16  ;;  %v2057_v36 = vpop.f32.mrb[28].mxu0  ;;  %v2962_v32 = vld [vmem:[%s3611_s9 + $0x8] sm:$0xff] }
 0xf8a   : > { %v2079_v41 = vadd.f32 %v2961_v37, %v2057_v36  ;;  %v2756_v42 = vpop.f32.mrb[29].mxu0 }
 0xf8b   : > { %1982 = vrot.lane.b32.xlu1 %v2748_v23, %s2990_s10  ;;  %v2060_v39 = vpop.f32.mrb[30].mxu0 }
 0xf8c   : > { %v2080_v28 = vadd.f32 %v2962_v32, %v2060_v39  ;;  %v2757_v46 = vpop.f32.mrb[31].mxu0  ;;  %v3515_v48 = vadd.f32 %v3506_v45, %v2079_v41 }
 0xf8e   : > { %v3518_v49 = vadd.f32 %v3506_v45, %v2080_v28 }
 0xf90   : > { %v2096_v51 = vpack.c.bf16 %v3518_v49, %v3515_v48 }
 0xf92   : > { %2771 = vmatmul.mubr.msk.bf16.vlgmr.msra.gmra.mrb[48].mxu1 %vm482_vm3, %v2096_v51 }
 0xf93   : > { %2774 = vmatprep.mubr.msk.bf16.mxu1 %vm2975_vm2, %v2974_v6 }
 0xff5   : > { %v1979_v61 = vpop.permute.xlu1 %1978 }
 0xff6   : > { %1987 = vst.msk [vmem:[#allocation2 + $0x11] sm:$0xff] %vm1264_vm12, %v1979_v61 }
 0xff7   : > { %v1981_v62 = vpop.permute.xlu0 %1980 }
 0xff8   : > { %1988 = vst.msk [vmem:[#allocation2 + $0x19] sm:$0xff] %vm1264_vm12, %v1981_v62 }
 0xff9   : > { %v1623_v63 = vpop.permute.xlu1 %1622 }
 0xffa   : > { %1629 = vst.msk [vmem:[#allocation2 + $0x21] sm:$0x1] %vm903_vm13, %v1623_v63 }
 0xffb   : > { %v1803_v2 = vpop.permute.xlu0 %1802 }
 0xffc   : > { %1809 = vst.msk [vmem:[#allocation2 + $0x21] sm:$0x1] %vm1085_vm14, %v1803_v2 }
 0xffd   : > { %v1983_v7 = vpop.permute.xlu1 %1982  ;;  %v1992_v44 = vld [vmem:[#allocation2 + $0x10] sm:$0xff] }
 0xffe   : > { %1989 = vst.msk [vmem:[#allocation2 + $0x21] sm:$0x1] %vm1267_vm15, %v1983_v7 }
 0xfff   : > { %v1993_v1 = vld [vmem:[#allocation2 + $0x18] sm:$0xff] }
0x1000   : > { %v1996_v3 = vpack.c.bf16 %v1993_v1, %v1992_v44 }
0x1002   : > { %2759 = vmatmul.mubr.msk.bf16.gmra.mrb[32].mxu0 %vm482_vm3, %v1996_v3 }
0x1003   : > { %2762 = vmatprep.mubr.msk.bf16.mxu0 %vm2975_vm2, %v2974_v6 }
0x1005   : > { %v1994_v0 = vld [vmem:[#allocation2 + $0x20] sm:$0x3] }
0x1006   : > { %v1997_v4 = vpack.c.bf16 %v1994_v0, %v1994_v0 }
0x100a   : > { %2763 = vmatmul.mubr.msk.bf16.gmra.mrb[36].mxu0 %vm482_vm3, %v1997_v4 }
0x100b   : > { %2798 = vmatprep.mubr.msk.bf16.mxu0 %vm2975_vm2, %v2974_v6 }
0x1065   : > { %v2165_v9 = vpop.f32.mrb[48].mxu1 }
0x1066   : > { %v2166_v33 = vadd.f32 %v2495_v5, %v2165_v9  ;;  %v2772_v52 = vpop.f32.mrb[49].mxu1 }
0x1067   : > { %v2168_v53 = vpop.f32.mrb[50].mxu1 }
0x1068   : > { %v2169_v55 = vadd.f32 %v2495_v5, %v2168_v53  ;;  %v2773_v40 = vpop.f32.mrb[51].mxu1  ;;  %v2187_v38 = vmax.f32 %v2166_v33, 0.0 }
0x106a   : > { %v2188_v10 = vmax.f32 %v2169_v55, 0.0 }
0x106c   : > { %v2192_v50 = vpack.c.bf16 %v2188_v10, %v2187_v38 }
0x106e   : > { %2799 = vmatmul.mubr.bf16.vlgmr.msra.gmra.mrb[40].mxu0 %v2192_v50 }
0x106f   : > { %2802 = vmatprep.mubr.msk.bf16.mxu0 %vm2975_vm2, %v2974_v6 }
0x10d5   : > { %v2065_v11 = vpop.f32.mrb[32].mxu0 }
0x10d6   : > { %v2081_v12 = vadd.f32 %v2963_v8, %v2065_v11  ;;  %v2760_v13 = vpop.f32.mrb[33].mxu0 }
0x10d7   : > { %v2068_v14 = vpop.f32.mrb[34].mxu0 }
0x10d8   : > { %v2082_v16 = vadd.f32 %v2964_v15, %v2068_v14  ;;  %v2761_v17 = vpop.f32.mrb[35].mxu0  ;;  %v2093_v18 = vadd.f32 %v3506_v45, %v2081_v12 }
0x10da   : > { %v2094_v19 = vadd.f32 %v3506_v45, %v2082_v16 }
0x10dc   : > { %v2097_v20 = vpack.c.bf16 %v2094_v19, %v2093_v18 }
0x10dd   : > { %v2073_v21 = vpop.f32.mrb[36].mxu0 }
0x10de   : > { %v2083_v24 = vadd.f32 %v2965_v22, %v2073_v21  ;;  %v2764_v25 = vpop.f32.mrb[37].mxu0  ;;  %2775 = vmatmul.mubr.msk.bf16.gmra.mrb[52].mxu1 %vm482_vm3, %v2097_v20 }
0x10df   : > { %v2076_v26 = vpop.f32.mrb[38].mxu0  ;;  %2778 = vmatprep.mubr.msk.bf16.mxu1 %vm2975_vm2, %v2974_v6 }
0x10e0   : > { %v2095_v27 = vadd.f32 %v3506_v45, %v2083_v24  ;;  %v2765_v29 = vpop.f32.mrb[39].mxu0 }
0x10e2   : > { %v2098_v30 = vpack.c.bf16 %v2095_v27, %v2095_v27 }
0x10e6   : > { %2779 = vmatmul.mubr.msk.bf16.gmra.mrb[56].mxu1 %vm482_vm3, %v2098_v30 }
0x1141   : > { %v2293_v23 = vpop.f32.mrb[40].mxu0 }
0x1142   : > { %v2315_v34 = vadd.f32 %v2293_v23, %v3515_v48  ;;  %v2800_v35 = vpop.f32.mrb[41].mxu0 }
0x1143   : > { %v2296_v36 = vpop.f32.mrb[42].mxu0 }
0x1144   : > { %v2327_v37 = vadd.f32 %v2509_v31, %v2315_v34  ;;  %v2316_v41 = vadd.f32 %v2296_v36, %v3518_v49  ;;  %v2801_v42 = vpop.f32.mrb[43].mxu0 }
0x1146   : > { %2332 = vst.msk [vmem:[%s3611_s9] sm:$0xff] %vm482_vm3, %v2327_v37  ;;  %v2328_v43 = vadd.f32 %v2509_v31, %v2316_v41 }
0x1148   : > { %2333 = vst.msk [vmem:[%s3611_s9 + $0x8] sm:$0xff] %vm482_vm3, %v2328_v43 }
0x11b1   : > { %v2173_v45 = vpop.f32.mrb[52].mxu1 }
0x11b2   : > { %v2174_v39 = vadd.f32 %v2495_v5, %v2173_v45  ;;  %v2776_v32 = vpop.f32.mrb[53].mxu1 }
0x11b3   : > { %v2176_v28 = vpop.f32.mrb[54].mxu1 }
0x11b4   : > { %v2177_v46 = vadd.f32 %v2495_v5, %v2176_v28  ;;  %v2777_v47 = vpop.f32.mrb[55].mxu1  ;;  %v2189_v48 = vmax.f32 %v2174_v39, 0.0 }
0x11b6   : > { %v2190_v49 = vmax.f32 %v2177_v46, 0.0 }
0x11b8   : > { %v2193_v51 = vpack.c.bf16 %v2190_v49, %v2189_v48 }
0x11b9   : > { %v2181_v54 = vpop.f32.mrb[56].mxu1 }
0x11ba   : > { %v2182_v56 = vadd.f32 %v2495_v5, %v2181_v54  ;;  %v2780_v57 = vpop.f32.mrb[57].mxu1  ;;  %2803 = vmatmul.mubr.bf16.gmra.mrb[44].mxu0 %v2193_v51 }
0x11bb   : > { %v2184_v58 = vpop.f32.mrb[58].mxu1  ;;  %2806 = vmatprep.mubr.msk.bf16.mxu0 %vm2975_vm2, %v2974_v6 }
0x11bc   : > { %v2191_v59 = vmax.f32 %v2182_v56, 0.0  ;;  %v2781_v60 = vpop.f32.mrb[59].mxu1 }
0x11be   : > { %v2194_v61 = vpack.c.bf16 %v2191_v59, %v2191_v59 }
0x11c2   : > { %2807 = vmatmul.mubr.bf16.gmra.mrb[48].mxu0 %v2194_v61 }
0x128d   : > { %v2301_v62 = vpop.f32.mrb[44].mxu0 }
0x128e   : > { %v2317_v63 = vadd.f32 %v2301_v62, %v2093_v18  ;;  %v2804_v2 = vpop.f32.mrb[45].mxu0 }
0x128f   : > { %v2304_v7 = vpop.f32.mrb[46].mxu0 }
0x1290   : > { %v2329_v44 = vadd.f32 %v2509_v31, %v2317_v63  ;;  %v2318_v1 = vadd.f32 %v2304_v7, %v2094_v19  ;;  %v2805_v3 = vpop.f32.mrb[47].mxu0 }
0x1292   : > { %2334 = vst.msk [vmem:[%s3611_s9 + $0x10] sm:$0xff] %vm482_vm3, %v2329_v44  ;;  %v2330_v0 = vadd.f32 %v2509_v31, %v2318_v1 }
0x1294   : > { %2335 = vst.msk [vmem:[%s3611_s9 + $0x18] sm:$0xff] %vm482_vm3, %v2330_v0 }
0x1295   : > { %v2309_v6 = vpop.f32.mrb[48].mxu0 }
0x1296   : > { %v2319_v4 = vadd.f32 %v2309_v6, %v2095_v27  ;;  %v2808_v5 = vpop.f32.mrb[49].mxu0 }
0x1297   : > { %v2312_v9 = vpop.f32.mrb[50].mxu0 }
0x1298   : > { %v2331_v33 = vadd.f32 %v2509_v31, %v2319_v4  ;;  %v2809_v52 = vpop.f32.mrb[51].mxu0 }
0x129a   : > { %2337 = vst.msk [vmem:[%s3611_s9 + $0x20] sm:$0x3] %vm2336_vm0, %v2331_v33 }
0x129b PF: > { %s19_s30 = sadd.s32 1, %s2972_s30  }
0x129c   : > { %p16_p5 = scmp.ge.s32.totalorder %s19_s30, 4  }
0x129e   :  { %18 = sbr.rel (!%p16_p5) target bundleno = 1 (0x1), region = 107 }

</bundles_post_ra>
